<compile_context>
chip_gen: v5e
topology: v5e:2x2
jax: 0.10.0
libtpu: 0.0.40
codegen_flags: <defaults>
</compile_context>

<pallas_src>
import functools

import jax
import jax.numpy as jnp
from jax import lax
from jax.experimental import pallas as pl
from jax.experimental.pallas import tpu as pltpu


# ---------------------------------------------------------------------------
# Kernel
# ---------------------------------------------------------------------------
def _triple_tower_kernel(x_ref, w_ih_ref, w_hh_ref,
                         attn_w_ref, attn_b_ref,
                         w1_ref, b1_ref, w2_ref, b2_ref, w3_ref, lp_ref,
                         out_ref, xg_ref, *, T, B, H):
    H3 = 3 * H        # sigmoid (i/f/o) span inside one tower block
    H4 = 4 * H        # one tower's gate block (128 lanes when H=32)

    # --- Hoisted input projection for all t and all towers; bias is folded in
    #     via the ones column of x.  Staged through VMEM scratch so the
    #     (T*B, 12H) result is not kept live in vregs across the unrolled loop.
    xg_ref[...] = jnp.dot(x_ref[...], w_ih_ref[...],
                          preferred_element_type=jnp.float32)

    # Per-tower recurrent weights, hoisted (3 x (H, 4H), 0.5 baked into i/f/o).
    whh = [w_hh_ref[k] for k in range(3)]

    hs = [jnp.zeros((B, H), jnp.float32) for _ in range(3)]
    cs = [jnp.zeros((B, H), jnp.float32) for _ in range(3)]

    # --- Three independent tower chains, statically unrolled over T.
    #     Per-tower gate layout: [ I | F | O | G ], i/f/o pre-scaled by 0.5 so
    #     a single tanh covers all four gates of the tower.
    for t in range(T):
        r0 = t * B
        for k in range(3):
            c0 = k * H4
            gates = (xg_ref[r0:r0 + B, c0:c0 + H4]
                     + jnp.dot(hs[k], whh[k],
                               preferred_element_type=jnp.float32))   # (B, 4H)
            tg = jnp.tanh(gates)                 # one EUP dispatch per tower
            sig = tg[:, :H3] * 0.5 + 0.5         # sigmoid(i/f/o)
            i_g = sig[:, 0:H]
            f_g = sig[:, H:2 * H]
            o_g = sig[:, 2 * H:H3]
            g_g = tg[:, H3:H4]                   # tanh(g), unscaled columns
            cs[k] = f_g * cs[k] + i_g * g_g
            hs[k] = o_g * jnp.tanh(cs[k])

    # --- Attention over the 3 towers: per-tower block matmuls (score of tower
    #     k lands in column k; columns 3..7 are padding).
    scores = (jnp.dot(hs[0], attn_w_ref[0], preferred_element_type=jnp.float32)
              + jnp.dot(hs[1], attn_w_ref[1], preferred_element_type=jnp.float32)
              + jnp.dot(hs[2], attn_w_ref[2], preferred_element_type=jnp.float32)
              + attn_b_ref[...])                                       # (B, 8)
    s0 = scores[:, 0:1]
    s1 = scores[:, 1:2]
    s2 = scores[:, 2:3]
    m = jnp.maximum(jnp.maximum(s0, s1), s2)
    e = jnp.exp(scores - m)                       # one EUP exp over (B, 8)
    e0 = e[:, 0:1]
    e1 = e[:, 1:2]
    e2 = e[:, 2:3]
    inv = pl.reciprocal(e0 + e1 + e2, approx=False)
    h_final = (e0 * hs[0] + e1 * hs[1] + e2 * hs[2]) * inv             # (B, H)

    # --- MLP head; cumsum (tri) and b3 are pre-folded into w3_ref / lp_ref.
    h1 = jnp.maximum(jnp.dot(h_final, w1_ref[...],
                             preferred_element_type=jnp.float32) + b1_ref[...],
                     0.0)
    h2 = jnp.maximum(jnp.dot(h1, w2_ref[...],
                             preferred_element_type=jnp.float32) + b2_ref[...],
                     0.0)
    out_ref[...] = (jnp.dot(h2, w3_ref[...],
                            preferred_element_type=jnp.float32)
                    + lp_ref[...])                                     # (B,128)


# ---------------------------------------------------------------------------
# Wrapper
# ---------------------------------------------------------------------------
def weighted_triple_tower_lstm(x, packed, future_len=60):
    """x: (B, T, 8) float32. Returns (B, future_len, 2), matching PyTorch."""
    B, T, D = x.shape
    assert D == 8
    H = packed['w1'].shape[0]
    F2 = future_len * 2
    F2P = packed['w3tri'].shape[1]            # padded to 128 lanes

    # Time-major flattened input + ones column (bias folded into w_ih).
    x_tm = jnp.transpose(x, (1, 0, 2)).reshape(T * B, D).astype(jnp.float32)
    x_aug = jnp.concatenate(
        [x_tm, jnp.ones((T * B, 1), jnp.float32)], axis=1)            # (T*B, 9)

    # Last observed position, tiled & lane-padded; b3 @ tri folded in here.
    last_pos = x[:, -1, :2].astype(jnp.float32)
    lp = jnp.zeros((B, F2P), jnp.float32).at[:, :F2].set(
        jnp.tile(last_pos, (1, future_len)))
    lp = lp + packed['b3tri']

    kern = functools.partial(_triple_tower_kernel, T=T, B=B, H=H)
    vmem = pl.BlockSpec(memory_space=pltpu.MemorySpace.VMEM)
    inputs = (x_aug, packed['w_ih'], packed['w_hh'],
              packed['attn_w'], packed['attn_b'],
              packed['w1'], packed['b1'], packed['w2'], packed['b2'],
              packed['w3tri'], lp)

    out = pl.pallas_call(
        kern,
        out_shape=jax.ShapeDtypeStruct((B, F2P), jnp.float32),
        in_specs=[vmem] * len(inputs),
        out_specs=vmem,
        scratch_shapes=[pltpu.VMEM((T * B, 12 * H), jnp.float32)],
    )(*inputs)
    return out[:, :F2].reshape(B, future_len, 2)


# ---------------------------------------------------------------------------
# Parameters (PyTorch-shaped raw params + packing into the fused kernel layout)
# ---------------------------------------------------------------------------
_FEATURE_SEL = ((2, 3, 4, 5),                 # motion  = x[:, :, 2:6]
                (0, 1, 4, 5),                 # spatial = x[:, :, [0,1,4,5]]
                (0, 1, 2, 3, 4, 5, 6, 7))     # unified = x


def init_raw_params(key, hidden_size=32, future_len=60):
    """Deterministic synthetic parameters with PyTorch-module shapes."""
    H = hidden_size
    F2 = future_len * 2
    ks = iter(jax.random.split(key, 20))
    scale = 1.0 / (H ** 0.5)

    def unif(shape):
        return jax.random.uniform(next(ks), shape, jnp.float32, -scale, scale)

    towers = []
    for in_dim in (4, 4, 8):                  # motion, spatial, unified
        towers.append(dict(
            w_ih=unif((4 * H, in_dim)),       # torch weight_ih_l0 (gate order i,f,g,o)
            w_hh=unif((4 * H, H)),            # torch weight_hh_l0
            b_ih=unif((4 * H,)),
            b_hh=unif((4 * H,)),
        ))
    return dict(
        towers=towers,
        attn_w=unif((1, H)),                  # Linear(H, 1).weight
        attn_b=unif((1,)),
        w1=unif((H, H)), b1=unif((H,)),
        w2=unif((H, H)), b2=unif((H,)),
        w3=unif((F2, H)), b3=unif((F2,)),
    )


def pack_params(raw, hidden_size=32, future_len=60, f2_pad=128):
    """Build fused, kernel-layout parameters from the raw PyTorch-shaped ones."""
    H = hidden_size
    F2 = future_len * 2
    H3, H4, H12 = 3 * H, 4 * H, 12 * H

    # torch gate row order within the 4H axis: [i, f, g, o]
    torch_rows = {'i': 0, 'f': 1, 'g': 2, 'o': 3}
    # fused per-tower gate column blocks: [ I | F | O | G ]
    fused_cols = {'i': 0, 'f': 1, 'o': 2, 'g': 3}
    # 0.5 pre-scale baked into sigmoid gates (sigmoid(x)=0.5*tanh(0.5x)+0.5)
    gate_scale = {'i': 0.5, 'f': 0.5, 'o': 0.5, 'g': 1.0}

    # w_ih: (9, 12H) tower-major; row 8 holds the fused bias (b_ih + b_hh).
    w_ih = jnp.zeros((9, H12), jnp.float32)
    # w_hh: (3, H, 4H) — per-tower recurrent weights.
    w_hh = jnp.zeros((3, H, H4), jnp.float32)
    for k, tower in enumerate(raw['towers']):
        sel = jnp.array(_FEATURE_SEL[k])
        wi, wh = tower['w_ih'], tower['w_hh']
        bb = tower['b_ih'] + tower['b_hh']
        # Bake feature selection: raw feature sel[j] feeds tower input j.
        wi8 = jnp.zeros((8, 4 * H), jnp.float32).at[sel, :].set(wi.T)
        for gate, trow in torch_rows.items():
            s = gate_scale[gate]
            src = slice(trow * H, (trow + 1) * H)
            col0 = k * H4 + fused_cols[gate] * H
            w_ih = w_ih.at[:8, col0:col0 + H].set(s * wi8[:, src])
            w_ih = w_ih.at[8, col0:col0 + H].set(s * bb[src])
            gcol = fused_cols[gate] * H
            w_hh = w_hh.at[k, :, gcol:gcol + H].set(s * wh[src, :].T)

    # Per-tower block attention matrices: tower k's score lands in column k.
    attn_w = jnp.zeros((3, H, 8), jnp.float32)
    for k in range(3):
        attn_w = attn_w.at[k, :, k].set(raw['attn_w'][0])
    attn_b = raw['attn_b'].reshape(1, 1)

    # Head: fold interleaved lower-triangular cumsum (tri) into w3 / b3.
    w3p = jnp.zeros((H, f2_pad), jnp.float32).at[:, :F2].set(raw['w3'].T)
    b3p = jnp.zeros((1, f2_pad), jnp.float32).at[0, :F2].set(raw['b3'])
    idx = jnp.arange(f2_pad)
    valid = idx < F2
    tri = (((idx[:, None] // 2) <= (idx[None, :] // 2)) &
           ((idx[:, None] % 2) == (idx[None, :] % 2)) &
           valid[:, None] & valid[None, :]).astype(jnp.float32)
    w3_tri = w3p @ tri                         # (H, 128), cumsum pre-applied
    b3_tri = b3p @ tri                         # (1, 128), added into lp

    return dict(
        w_ih=w_ih, w_hh=w_hh,
        attn_w=attn_w, attn_b=attn_b,
        w1=raw['w1'].T, b1=raw['b1'][None, :],
        w2=raw['w2'].T, b2=raw['b2'][None, :],
        w3tri=w3_tri, b3tri=b3_tri,
    )


# ---------------------------------------------------------------------------
# Pure-JAX reference mirroring the PyTorch forward (for verification)
# ---------------------------------------------------------------------------
def reference_forward(x, raw, hidden_size=32, future_len=60):
    B, T, _ = x.shape
    H = hidden_size

    def lstm_last_h(xseq, tower):
        wi, wh = tower['w_ih'], tower['w_hh']
        b = tower['b_ih'] + tower['b_hh']

        def step(carry, xt):
            h, c = carry
            gates = xt @ wi.T + h @ wh.T + b
            i_g = jax.nn.sigmoid(gates[:, 0:H])
            f_g = jax.nn.sigmoid(gates[:, H:2 * H])
            g_g = jnp.tanh(gates[:, 2 * H:3 * H])
            o_g = jax.nn.sigmoid(gates[:, 3 * H:4 * H])
            c = f_g * c + i_g * g_g
            h = o_g * jnp.tanh(c)
            return (h, c), None

        init = (jnp.zeros((B, H), jnp.float32), jnp.zeros((B, H), jnp.float32))
        (h, _), _ = lax.scan(step, init, jnp.transpose(xseq, (1, 0, 2)))
        return h

    motion = x[:, :, 2:6]
    spatial = x[:, :, (0, 1, 4, 5)]
    h_m = lstm_last_h(motion, raw['towers'][0])
    h_s = lstm_last_h(spatial, raw['towers'][1])
    h_u = lstm_last_h(x, raw['towers'][2])

    h_stack = jnp.stack([h_m, h_s, h_u], axis=1)               # (B, 3, H)
    scores = h_stack @ raw['attn_w'].T + raw['attn_b']         # (B, 3, 1)
    weights = jax.nn.softmax(scores, axis=1)
    h_final = (weights * h_stack).sum(axis=1)                  # (B, H)

    h1 = jnp.maximum(h_final @ raw['w1'].T + raw['b1'], 0.0)
    h2 = jnp.maximum(h1 @ raw['w2'].T + raw['b2'], 0.0)
    delta = (h2 @ raw['w3'].T + raw['b3']).reshape(B, future_len, 2)
    last_pos = x[:, -1, :2]
    return last_pos[:, None, :] + jnp.cumsum(delta, axis=1)


# ---------------------------------------------------------------------------
if __name__ == "__main__":
    B, T, D_IN = 8, 8, 8      # B=8 fills all f32 sublanes of each vreg
    HIDDEN = 32
    FUTURE = 60

    key = jax.random.PRNGKey(0)
    k_x, k_p = jax.random.split(key)
    x = jax.random.normal(k_x, (B, T, D_IN), jnp.float32)
    raw = init_raw_params(k_p, hidden_size=HIDDEN, future_len=FUTURE)
    packed = pack_params(raw, hidden_size=HIDDEN, future_len=FUTURE)

    out = weighted_triple_tower_lstm(x, packed, future_len=FUTURE)
    out = jax.block_until_ready(out)

    ref = reference_forward(x, raw, hidden_size=HIDDEN, future_len=FUTURE)
    assert out.shape == (B, FUTURE, 2)
    err = jnp.max(jnp.abs(out - ref))
    assert jnp.allclose(out, ref, atol=1e-4, rtol=1e-4), f"max abs err {err}"

    print("KERNEL_OK")
</pallas_src>

<mosaic_0001>
module attributes {stable_mosaic.version = 11 : i64} {
  func.func @_triple_tower_kernel(%arg0: memref<64x9xf32, #tpu.memory_space<vmem>>, %arg1: memref<9x384xf32, #tpu.memory_space<vmem>>, %arg2: memref<3x32x128xf32, #tpu.memory_space<vmem>>, %arg3: memref<3x32x8xf32, #tpu.memory_space<vmem>>, %arg4: memref<1x1xf32, #tpu.memory_space<vmem>>, %arg5: memref<32x32xf32, #tpu.memory_space<vmem>>, %arg6: memref<1x32xf32, #tpu.memory_space<vmem>>, %arg7: memref<32x32xf32, #tpu.memory_space<vmem>>, %arg8: memref<1x32xf32, #tpu.memory_space<vmem>>, %arg9: memref<32x128xf32, #tpu.memory_space<vmem>>, %arg10: memref<8x128xf32, #tpu.memory_space<vmem>>, %arg11: memref<8x128xf32, #tpu.memory_space<vmem>>, %arg12: memref<64x384xf32, #tpu.memory_space<vmem>>) attributes {dimension_semantics = [], scalar_prefetch = 0 : i64, scratch_operands = 1 : i64, tpu.core_type = #tpu.core_type<tc>} {
    %c0 = arith.constant 0 : index
    %c0_0 = arith.constant 0 : index
    %0 = vector.load %arg0[%c0, %c0_0] : memref<64x9xf32, #tpu.memory_space<vmem>>, vector<64x9xf32>
    %c0_1 = arith.constant 0 : index
    %c0_2 = arith.constant 0 : index
    %1 = vector.load %arg1[%c0_1, %c0_2] : memref<9x384xf32, #tpu.memory_space<vmem>>, vector<9x384xf32>
    %cst = arith.constant dense<0.000000e+00> : vector<64x384xf32>
    %2 = tpu.matmul %0, %1, %cst {dimension_numbers = #tpu.dot_dimension_numbers<[1], [0], [0], [1], [0, 0, 1, 1], [], []>} : vector<64x9xf32>, vector<9x384xf32>, vector<64x384xf32> -> vector<64x384xf32>
    %c0_3 = arith.constant 0 : index
    %c0_4 = arith.constant 0 : index
    %3 = vector.load %arg12[%c0_3, %c0_4] : memref<64x384xf32, #tpu.memory_space<vmem>>, vector<64x384xf32>
    tpu.vector_store %arg12[%c0_3, %c0_4], %2 {strides = array<i32>} : memref<64x384xf32, #tpu.memory_space<vmem>>, vector<64x384xf32>,
    %c0_5 = arith.constant 0 : index
    %c0_6 = arith.constant 0 : index
    %c0_7 = arith.constant 0 : index
    %4 = vector.load %arg2[%c0_5, %c0_6, %c0_7] : memref<3x32x128xf32, #tpu.memory_space<vmem>>, vector<1x32x128xf32>
    %5 = vector.shape_cast %4 : vector<1x32x128xf32> to vector<32x128xf32>
    %c1 = arith.constant 1 : index
    %c0_8 = arith.constant 0 : index
    %c0_9 = arith.constant 0 : index
    %6 = vector.load %arg2[%c1, %c0_8, %c0_9] : memref<3x32x128xf32, #tpu.memory_space<vmem>>, vector<1x32x128xf32>
    %7 = vector.shape_cast %6 : vector<1x32x128xf32> to vector<32x128xf32>
    %c2 = arith.constant 2 : index
    %c0_10 = arith.constant 0 : index
    %c0_11 = arith.constant 0 : index
    %8 = vector.load %arg2[%c2, %c0_10, %c0_11] : memref<3x32x128xf32, #tpu.memory_space<vmem>>, vector<1x32x128xf32>
    %9 = vector.shape_cast %8 : vector<1x32x128xf32> to vector<32x128xf32>
    %cst_12 = arith.constant 0.000000e+00 : f32
    %10 = vector.broadcast %cst_12 : f32 to vector<8x32xf32>
    %cst_13 = arith.constant 0.000000e+00 : f32
    %11 = vector.broadcast %cst_13 : f32 to vector<8x32xf32>
    %cst_14 = arith.constant 0.000000e+00 : f32
    %12 = vector.broadcast %cst_14 : f32 to vector<8x32xf32>
    %cst_15 = arith.constant 0.000000e+00 : f32
    %13 = vector.broadcast %cst_15 : f32 to vector<8x32xf32>
    %cst_16 = arith.constant 0.000000e+00 : f32
    %14 = vector.broadcast %cst_16 : f32 to vector<8x32xf32>
    %cst_17 = arith.constant 0.000000e+00 : f32
    %15 = vector.broadcast %cst_17 : f32 to vector<8x32xf32>
    %c0_18 = arith.constant 0 : index
    %c0_19 = arith.constant 0 : index
    %16 = vector.load %arg12[%c0_18, %c0_19] : memref<64x384xf32, #tpu.memory_space<vmem>>, vector<8x128xf32>
    %cst_20 = arith.constant dense<0.000000e+00> : vector<8x128xf32>
    %17 = tpu.matmul %10, %5, %cst_20 {dimension_numbers = #tpu.dot_dimension_numbers<[1], [0], [0], [1], [0, 0, 1, 1], [], []>} : vector<8x32xf32>, vector<32x128xf32>, vector<8x128xf32> -> vector<8x128xf32>
    %18 = arith.addf %16, %17 : vector<8x128xf32>
    %19 = math.tanh %18 : vector<8x128xf32>
    %20 = vector.extract_strided_slice %19 {offsets = [0, 0], sizes = [8, 96], strides = [1, 1]} : vector<8x128xf32> to vector<8x96xf32>
    %cst_21 = arith.constant 5.000000e-01 : f32
    %21 = vector.broadcast %cst_21 : f32 to vector<8x96xf32>
    %22 = arith.mulf %20, %21 : vector<8x96xf32>
    %cst_22 = arith.constant 5.000000e-01 : f32
    %23 = vector.broadcast %cst_22 : f32 to vector<8x96xf32>
    %24 = arith.addf %22, %23 : vector<8x96xf32>
    %25 = vector.extract_strided_slice %24 {offsets = [0, 0], sizes = [8, 32], strides = [1, 1]} : vector<8x96xf32> to vector<8x32xf32>
    %26 = vector.extract_strided_slice %24 {offsets = [0, 32], sizes = [8, 32], strides = [1, 1]} : vector<8x96xf32> to vector<8x32xf32>
    %27 = vector.extract_strided_slice %24 {offsets = [0, 64], sizes = [8, 32], strides = [1, 1]} : vector<8x96xf32> to vector<8x32xf32>
    %28 = vector.extract_strided_slice %19 {offsets = [0, 96], sizes = [8, 32], strides = [1, 1]} : vector<8x128xf32> to vector<8x32xf32>
    %29 = arith.mulf %26, %13 : vector<8x32xf32>
    %30 = arith.mulf %25, %28 : vector<8x32xf32>
    %31 = arith.addf %29, %30 : vector<8x32xf32>
    %32 = math.tanh %31 : vector<8x32xf32>
    %33 = arith.mulf %27, %32 : vector<8x32xf32>
    %c0_23 = arith.constant 0 : index
    %c128 = arith.constant 128 : index
    %34 = vector.load %arg12[%c0_23, %c128] : memref<64x384xf32, #tpu.memory_space<vmem>>, vector<8x128xf32>
    %cst_24 = arith.constant dense<0.000000e+00> : vector<8x128xf32>
    %35 = tpu.matmul %11, %7, %cst_24 {dimension_numbers = #tpu.dot_dimension_numbers<[1], [0], [0], [1], [0, 0, 1, 1], [], []>} : vector<8x32xf32>, vector<32x128xf32>, vector<8x128xf32> -> vector<8x128xf32>
    %36 = arith.addf %34, %35 : vector<8x128xf32>
    %37 = math.tanh %36 : vector<8x128xf32>
    %38 = vector.extract_strided_slice %37 {offsets = [0, 0], sizes = [8, 96], strides = [1, 1]} : vector<8x128xf32> to vector<8x96xf32>
    %cst_25 = arith.constant 5.000000e-01 : f32
    %39 = vector.broadcast %cst_25 : f32 to vector<8x96xf32>
    %40 = arith.mulf %38, %39 : vector<8x96xf32>
    %cst_26 = arith.constant 5.000000e-01 : f32
    %41 = vector.broadcast %cst_26 : f32 to vector<8x96xf32>
    %42 = arith.addf %40, %41 : vector<8x96xf32>
    %43 = vector.extract_strided_slice %42 {offsets = [0, 0], sizes = [8, 32], strides = [1, 1]} : vector<8x96xf32> to vector<8x32xf32>
    %44 = vector.extract_strided_slice %42 {offsets = [0, 32], sizes = [8, 32], strides = [1, 1]} : vector<8x96xf32> to vector<8x32xf32>
    %45 = vector.extract_strided_slice %42 {offsets = [0, 64], sizes = [8, 32], strides = [1, 1]} : vector<8x96xf32> to vector<8x32xf32>
    %46 = vector.extract_strided_slice %37 {offsets = [0, 96], sizes = [8, 32], strides = [1, 1]} : vector<8x128xf32> to vector<8x32xf32>
    %47 = arith.mulf %44, %14 : vector<8x32xf32>
    %48 = arith.mulf %43, %46 : vector<8x32xf32>
    %49 = arith.addf %47, %48 : vector<8x32xf32>
    %50 = math.tanh %49 : vector<8x32xf32>
    %51 = arith.mulf %45, %50 : vector<8x32xf32>
    %c0_27 = arith.constant 0 : index
    %c256 = arith.constant 256 : index
    %52 = vector.load %arg12[%c0_27, %c256] : memref<64x384xf32, #tpu.memory_space<vmem>>, vector<8x128xf32>
    %cst_28 = arith.constant dense<0.000000e+00> : vector<8x128xf32>
    %53 = tpu.matmul %12, %9, %cst_28 {dimension_numbers = #tpu.dot_dimension_numbers<[1], [0], [0], [1], [0, 0, 1, 1], [], []>} : vector<8x32xf32>, vector<32x128xf32>, vector<8x128xf32> -> vector<8x128xf32>
    %54 = arith.addf %52, %53 : vector<8x128xf32>
    %55 = math.tanh %54 : vector<8x128xf32>
    %56 = vector.extract_strided_slice %55 {offsets = [0, 0], sizes = [8, 96], strides = [1, 1]} : vector<8x128xf32> to vector<8x96xf32>
    %cst_29 = arith.constant 5.000000e-01 : f32
    %57 = vector.broadcast %cst_29 : f32 to vector<8x96xf32>
    %58 = arith.mulf %56, %57 : vector<8x96xf32>
    %cst_30 = arith.constant 5.000000e-01 : f32
    %59 = vector.broadcast %cst_30 : f32 to vector<8x96xf32>
    %60 = arith.addf %58, %59 : vector<8x96xf32>
    %61 = vector.extract_strided_slice %60 {offsets = [0, 0], sizes = [8, 32], strides = [1, 1]} : vector<8x96xf32> to vector<8x32xf32>
    %62 = vector.extract_strided_slice %60 {offsets = [0, 32], sizes = [8, 32], strides = [1, 1]} : vector<8x96xf32> to vector<8x32xf32>
    %63 = vector.extract_strided_slice %60 {offsets = [0, 64], sizes = [8, 32], strides = [1, 1]} : vector<8x96xf32> to vector<8x32xf32>
    %64 = vector.extract_strided_slice %55 {offsets = [0, 96], sizes = [8, 32], strides = [1, 1]} : vector<8x128xf32> to vector<8x32xf32>
    %65 = arith.mulf %62, %15 : vector<8x32xf32>
    %66 = arith.mulf %61, %64 : vector<8x32xf32>
    %67 = arith.addf %65, %66 : vector<8x32xf32>
    %68 = math.tanh %67 : vector<8x32xf32>
    %69 = arith.mulf %63, %68 : vector<8x32xf32>
    %c8 = arith.constant 8 : index
    %c0_31 = arith.constant 0 : index
    %70 = vector.load %arg12[%c8, %c0_31] : memref<64x384xf32, #tpu.memory_space<vmem>>, vector<8x128xf32>
    %cst_32 = arith.constant dense<0.000000e+00> : vector<8x128xf32>
    %71 = tpu.matmul %33, %5, %cst_32 {dimension_numbers = #tpu.dot_dimension_numbers<[1], [0], [0], [1], [0, 0, 1, 1], [], []>} : vector<8x32xf32>, vector<32x128xf32>, vector<8x128xf32> -> vector<8x128xf32>
    %72 = arith.addf %70, %71 : vector<8x128xf32>
    %73 = math.tanh %72 : vector<8x128xf32>
    %74 = vector.extract_strided_slice %73 {offsets = [0, 0], sizes = [8, 96], strides = [1, 1]} : vector<8x128xf32> to vector<8x96xf32>
    %cst_33 = arith.constant 5.000000e-01 : f32
    %75 = vector.broadcast %cst_33 : f32 to vector<8x96xf32>
    %76 = arith.mulf %74, %75 : vector<8x96xf32>
    %cst_34 = arith.constant 5.000000e-01 : f32
    %77 = vector.broadcast %cst_34 : f32 to vector<8x96xf32>
    %78 = arith.addf %76, %77 : vector<8x96xf32>
    %79 = vector.extract_strided_slice %78 {offsets = [0, 0], sizes = [8, 32], strides = [1, 1]} : vector<8x96xf32> to vector<8x32xf32>
    %80 = vector.extract_strided_slice %78 {offsets = [0, 32], sizes = [8, 32], strides = [1, 1]} : vector<8x96xf32> to vector<8x32xf32>
    %81 = vector.extract_strided_slice %78 {offsets = [0, 64], sizes = [8, 32], strides = [1, 1]} : vector<8x96xf32> to vector<8x32xf32>
    %82 = vector.extract_strided_slice %73 {offsets = [0, 96], sizes = [8, 32], strides = [1, 1]} : vector<8x128xf32> to vector<8x32xf32>
    %83 = arith.mulf %80, %31 : vector<8x32xf32>
    %84 = arith.mulf %79, %82 : vector<8x32xf32>
    %85 = arith.addf %83, %84 : vector<8x32xf32>
    %86 = math.tanh %85 : vector<8x32xf32>
    %87 = arith.mulf %81, %86 : vector<8x32xf32>
    %c8_35 = arith.constant 8 : index
    %c128_36 = arith.constant 128 : index
    %88 = vector.load %arg12[%c8_35, %c128_36] : memref<64x384xf32, #tpu.memory_space<vmem>>, vector<8x128xf32>
    %cst_37 = arith.constant dense<0.000000e+00> : vector<8x128xf32>
    %89 = tpu.matmul %51, %7, %cst_37 {dimension_numbers = #tpu.dot_dimension_numbers<[1], [0], [0], [1], [0, 0, 1, 1], [], []>} : vector<8x32xf32>, vector<32x128xf32>, vector<8x128xf32> -> vector<8x128xf32>
    %90 = arith.addf %88, %89 : vector<8x128xf32>
    %91 = math.tanh %90 : vector<8x128xf32>
    %92 = vector.extract_strided_slice %91 {offsets = [0, 0], sizes = [8, 96], strides = [1, 1]} : vector<8x128xf32> to vector<8x96xf32>
    %cst_38 = arith.constant 5.000000e-01 : f32
    %93 = vector.broadcast %cst_38 : f32 to vector<8x96xf32>
    %94 = arith.mulf %92, %93 : vector<8x96xf32>
    %cst_39 = arith.constant 5.000000e-01 : f32
    %95 = vector.broadcast %cst_39 : f32 to vector<8x96xf32>
    %96 = arith.addf %94, %95 : vector<8x96xf32>
    %97 = vector.extract_strided_slice %96 {offsets = [0, 0], sizes = [8, 32], strides = [1, 1]} : vector<8x96xf32> to vector<8x32xf32>
    %98 = vector.extract_strided_slice %96 {offsets = [0, 32], sizes = [8, 32], strides = [1, 1]} : vector<8x96xf32> to vector<8x32xf32>
    %99 = vector.extract_strided_slice %96 {offsets = [0, 64], sizes = [8, 32], strides = [1, 1]} : vector<8x96xf32> to vector<8x32xf32>
    %100 = vector.extract_strided_slice %91 {offsets = [0, 96], sizes = [8, 32], strides = [1, 1]} : vector<8x128xf32> to vector<8x32xf32>
    %101 = arith.mulf %98, %49 : vector<8x32xf32>
    %102 = arith.mulf %97, %100 : vector<8x32xf32>
    %103 = arith.addf %101, %102 : vector<8x32xf32>
    %104 = math.tanh %103 : vector<8x32xf32>
    %105 = arith.mulf %99, %104 : vector<8x32xf32>
    %c8_40 = arith.constant 8 : index
    %c256_41 = arith.constant 256 : index
    %106 = vector.load %arg12[%c8_40, %c256_41] : memref<64x384xf32, #tpu.memory_space<vmem>>, vector<8x128xf32>
    %cst_42 = arith.constant dense<0.000000e+00> : vector<8x128xf32>
    %107 = tpu.matmul %69, %9, %cst_42 {dimension_numbers = #tpu.dot_dimension_numbers<[1], [0], [0], [1], [0, 0, 1, 1], [], []>} : vector<8x32xf32>, vector<32x128xf32>, vector<8x128xf32> -> vector<8x128xf32>
    %108 = arith.addf %106, %107 : vector<8x128xf32>
    %109 = math.tanh %108 : vector<8x128xf32>
    %110 = vector.extract_strided_slice %109 {offsets = [0, 0], sizes = [8, 96], strides = [1, 1]} : vector<8x128xf32> to vector<8x96xf32>
    %cst_43 = arith.constant 5.000000e-01 : f32
    %111 = vector.broadcast %cst_43 : f32 to vector<8x96xf32>
    %112 = arith.mulf %110, %111 : vector<8x96xf32>
    %cst_44 = arith.constant 5.000000e-01 : f32
    %113 = vector.broadcast %cst_44 : f32 to vector<8x96xf32>
    %114 = arith.addf %112, %113 : vector<8x96xf32>
    %115 = vector.extract_strided_slice %114 {offsets = [0, 0], sizes = [8, 32], strides = [1, 1]} : vector<8x96xf32> to vector<8x32xf32>
    %116 = vector.extract_strided_slice %114 {offsets = [0, 32], sizes = [8, 32], strides = [1, 1]} : vector<8x96xf32> to vector<8x32xf32>
    %117 = vector.extract_strided_slice %114 {offsets = [0, 64], sizes = [8, 32], strides = [1, 1]} : vector<8x96xf32> to vector<8x32xf32>
    %118 = vector.extract_strided_slice %109 {offsets = [0, 96], sizes = [8, 32], strides = [1, 1]} : vector<8x128xf32> to vector<8x32xf32>
    %119 = arith.mulf %116, %67 : vector<8x32xf32>
    %120 = arith.mulf %115, %118 : vector<8x32xf32>
    %121 = arith.addf %119, %120 : vector<8x32xf32>
    %122 = math.tanh %121 : vector<8x32xf32>
    %123 = arith.mulf %117, %122 : vector<8x32xf32>
    %c16 = arith.constant 16 : index
    %c0_45 = arith.constant 0 : index
    %124 = vector.load %arg12[%c16, %c0_45] : memref<64x384xf32, #tpu.memory_space<vmem>>, vector<8x128xf32>
    %cst_46 = arith.constant dense<0.000000e+00> : vector<8x128xf32>
    %125 = tpu.matmul %87, %5, %cst_46 {dimension_numbers = #tpu.dot_dimension_numbers<[1], [0], [0], [1], [0, 0, 1, 1], [], []>} : vector<8x32xf32>, vector<32x128xf32>, vector<8x128xf32> -> vector<8x128xf32>
    %126 = arith.addf %124, %125 : vector<8x128xf32>
    %127 = math.tanh %126 : vector<8x128xf32>
    %128 = vector.extract_strided_slice %127 {offsets = [0, 0], sizes = [8, 96], strides = [1, 1]} : vector<8x128xf32> to vector<8x96xf32>
    %cst_47 = arith.constant 5.000000e-01 : f32
    %129 = vector.broadcast %cst_47 : f32 to vector<8x96xf32>
    %130 = arith.mulf %128, %129 : vector<8x96xf32>
    %cst_48 = arith.constant 5.000000e-01 : f32
    %131 = vector.broadcast %cst_48 : f32 to vector<8x96xf32>
    %132 = arith.addf %130, %131 : vector<8x96xf32>
    %133 = vector.extract_strided_slice %132 {offsets = [0, 0], sizes = [8, 32], strides = [1, 1]} : vector<8x96xf32> to vector<8x32xf32>
    %134 = vector.extract_strided_slice %132 {offsets = [0, 32], sizes = [8, 32], strides = [1, 1]} : vector<8x96xf32> to vector<8x32xf32>
    %135 = vector.extract_strided_slice %132 {offsets = [0, 64], sizes = [8, 32], strides = [1, 1]} : vector<8x96xf32> to vector<8x32xf32>
    %136 = vector.extract_strided_slice %127 {offsets = [0, 96], sizes = [8, 32], strides = [1, 1]} : vector<8x128xf32> to vector<8x32xf32>
    %137 = arith.mulf %134, %85 : vector<8x32xf32>
    %138 = arith.mulf %133, %136 : vector<8x32xf32>
    %139 = arith.addf %137, %138 : vector<8x32xf32>
    %140 = math.tanh %139 : vector<8x32xf32>
    %141 = arith.mulf %135, %140 : vector<8x32xf32>
    %c16_49 = arith.constant 16 : index
    %c128_50 = arith.constant 128 : index
    %142 = vector.load %arg12[%c16_49, %c128_50] : memref<64x384xf32, #tpu.memory_space<vmem>>, vector<8x128xf32>
    %cst_51 = arith.constant dense<0.000000e+00> : vector<8x128xf32>
    %143 = tpu.matmul %105, %7, %cst_51 {dimension_numbers = #tpu.dot_dimension_numbers<[1], [0], [0], [1], [0, 0, 1, 1], [], []>} : vector<8x32xf32>, vector<32x128xf32>, vector<8x128xf32> -> vector<8x128xf32>
    %144 = arith.addf %142, %143 : vector<8x128xf32>
    %145 = math.tanh %144 : vector<8x128xf32>
    %146 = vector.extract_strided_slice %145 {offsets = [0, 0], sizes = [8, 96], strides = [1, 1]} : vector<8x128xf32> to vector<8x96xf32>
    %cst_52 = arith.constant 5.000000e-01 : f32
    %147 = vector.broadcast %cst_52 : f32 to vector<8x96xf32>
    %148 = arith.mulf %146, %147 : vector<8x96xf32>
    %cst_53 = arith.constant 5.000000e-01 : f32
    %149 = vector.broadcast %cst_53 : f32 to vector<8x96xf32>
    %150 = arith.addf %148, %149 : vector<8x96xf32>
    %151 = vector.extract_strided_slice %150 {offsets = [0, 0], sizes = [8, 32], strides = [1, 1]} : vector<8x96xf32> to vector<8x32xf32>
    %152 = vector.extract_strided_slice %150 {offsets = [0, 32], sizes = [8, 32], strides = [1, 1]} : vector<8x96xf32> to vector<8x32xf32>
    %153 = vector.extract_strided_slice %150 {offsets = [0, 64], sizes = [8, 32], strides = [1, 1]} : vector<8x96xf32> to vector<8x32xf32>
    %154 = vector.extract_strided_slice %145 {offsets = [0, 96], sizes = [8, 32], strides = [1, 1]} : vector<8x128xf32> to vector<8x32xf32>
    %155 = arith.mulf %152, %103 : vector<8x32xf32>
    %156 = arith.mulf %151, %154 : vector<8x32xf32>
    %157 = arith.addf %155, %156 : vector<8x32xf32>
    %158 = math.tanh %157 : vector<8x32xf32>
    %159 = arith.mulf %153, %158 : vector<8x32xf32>
    %c16_54 = arith.constant 16 : index
    %c256_55 = arith.constant 256 : index
    %160 = vector.load %arg12[%c16_54, %c256_55] : memref<64x384xf32, #tpu.memory_space<vmem>>, vector<8x128xf32>
    %cst_56 = arith.constant dense<0.000000e+00> : vector<8x128xf32>
    %161 = tpu.matmul %123, %9, %cst_56 {dimension_numbers = #tpu.dot_dimension_numbers<[1], [0], [0], [1], [0, 0, 1, 1], [], []>} : vector<8x32xf32>, vector<32x128xf32>, vector<8x128xf32> -> vector<8x128xf32>
    %162 = arith.addf %160, %161 : vector<8x128xf32>
    %163 = math.tanh %162 : vector<8x128xf32>
    %164 = vector.extract_strided_slice %163 {offsets = [0, 0], sizes = [8, 96], strides = [1, 1]} : vector<8x128xf32> to vector<8x96xf32>
    %cst_57 = arith.constant 5.000000e-01 : f32
    %165 = vector.broadcast %cst_57 : f32 to vector<8x96xf32>
    %166 = arith.mulf %164, %165 : vector<8x96xf32>
    %cst_58 = arith.constant 5.000000e-01 : f32
    %167 = vector.broadcast %cst_58 : f32 to vector<8x96xf32>
    %168 = arith.addf %166, %167 : vector<8x96xf32>
    %169 = vector.extract_strided_slice %168 {offsets = [0, 0], sizes = [8, 32], strides = [1, 1]} : vector<8x96xf32> to vector<8x32xf32>
    %170 = vector.extract_strided_slice %168 {offsets = [0, 32], sizes = [8, 32], strides = [1, 1]} : vector<8x96xf32> to vector<8x32xf32>
    %171 = vector.extract_strided_slice %168 {offsets = [0, 64], sizes = [8, 32], strides = [1, 1]} : vector<8x96xf32> to vector<8x32xf32>
    %172 = vector.extract_strided_slice %163 {offsets = [0, 96], sizes = [8, 32], strides = [1, 1]} : vector<8x128xf32> to vector<8x32xf32>
    %173 = arith.mulf %170, %121 : vector<8x32xf32>
    %174 = arith.mulf %169, %172 : vector<8x32xf32>
    %175 = arith.addf %173, %174 : vector<8x32xf32>
    %176 = math.tanh %175 : vector<8x32xf32>
    %177 = arith.mulf %171, %176 : vector<8x32xf32>
    %c24 = arith.constant 24 : index
    %c0_59 = arith.constant 0 : index
    %178 = vector.load %arg12[%c24, %c0_59] : memref<64x384xf32, #tpu.memory_space<vmem>>, vector<8x128xf32>
    %cst_60 = arith.constant dense<0.000000e+00> : vector<8x128xf32>
    %179 = tpu.matmul %141, %5, %cst_60 {dimension_numbers = #tpu.dot_dimension_numbers<[1], [0], [0], [1], [0, 0, 1, 1], [], []>} : vector<8x32xf32>, vector<32x128xf32>, vector<8x128xf32> -> vector<8x128xf32>
    %180 = arith.addf %178, %179 : vector<8x128xf32>
    %181 = math.tanh %180 : vector<8x128xf32>
    %182 = vector.extract_strided_slice %181 {offsets = [0, 0], sizes = [8, 96], strides = [1, 1]} : vector<8x128xf32> to vector<8x96xf32>
    %cst_61 = arith.constant 5.000000e-01 : f32
    %183 = vector.broadcast %cst_61 : f32 to vector<8x96xf32>
    %184 = arith.mulf %182, %183 : vector<8x96xf32>
    %cst_62 = arith.constant 5.000000e-01 : f32
    %185 = vector.broadcast %cst_62 : f32 to vector<8x96xf32>
    %186 = arith.addf %184, %185 : vector<8x96xf32>
    %187 = vector.extract_strided_slice %186 {offsets = [0, 0], sizes = [8, 32], strides = [1, 1]} : vector<8x96xf32> to vector<8x32xf32>
    %188 = vector.extract_strided_slice %186 {offsets = [0, 32], sizes = [8, 32], strides = [1, 1]} : vector<8x96xf32> to vector<8x32xf32>
    %189 = vector.extract_strided_slice %186 {offsets = [0, 64], sizes = [8, 32], strides = [1, 1]} : vector<8x96xf32> to vector<8x32xf32>
    %190 = vector.extract_strided_slice %181 {offsets = [0, 96], sizes = [8, 32], strides = [1, 1]} : vector<8x128xf32> to vector<8x32xf32>
    %191 = arith.mulf %188, %139 : vector<8x32xf32>
    %192 = arith.mulf %187, %190 : vector<8x32xf32>
    %193 = arith.addf %191, %192 : vector<8x32xf32>
    %194 = math.tanh %193 : vector<8x32xf32>
    %195 = arith.mulf %189, %194 : vector<8x32xf32>
    %c24_63 = arith.constant 24 : index
    %c128_64 = arith.constant 128 : index
    %196 = vector.load %arg12[%c24_63, %c128_64] : memref<64x384xf32, #tpu.memory_space<vmem>>, vector<8x128xf32>
    %cst_65 = arith.constant dense<0.000000e+00> : vector<8x128xf32>
    %197 = tpu.matmul %159, %7, %cst_65 {dimension_numbers = #tpu.dot_dimension_numbers<[1], [0], [0], [1], [0, 0, 1, 1], [], []>} : vector<8x32xf32>, vector<32x128xf32>, vector<8x128xf32> -> vector<8x128xf32>
    %198 = arith.addf %196, %197 : vector<8x128xf32>
    %199 = math.tanh %198 : vector<8x128xf32>
    %200 = vector.extract_strided_slice %199 {offsets = [0, 0], sizes = [8, 96], strides = [1, 1]} : vector<8x128xf32> to vector<8x96xf32>
    %cst_66 = arith.constant 5.000000e-01 : f32
    %201 = vector.broadcast %cst_66 : f32 to vector<8x96xf32>
    %202 = arith.mulf %200, %201 : vector<8x96xf32>
    %cst_67 = arith.constant 5.000000e-01 : f32
    %203 = vector.broadcast %cst_67 : f32 to vector<8x96xf32>
    %204 = arith.addf %202, %203 : vector<8x96xf32>
    %205 = vector.extract_strided_slice %204 {offsets = [0, 0], sizes = [8, 32], strides = [1, 1]} : vector<8x96xf32> to vector<8x32xf32>
    %206 = vector.extract_strided_slice %204 {offsets = [0, 32], sizes = [8, 32], strides = [1, 1]} : vector<8x96xf32> to vector<8x32xf32>
    %207 = vector.extract_strided_slice %204 {offsets = [0, 64], sizes = [8, 32], strides = [1, 1]} : vector<8x96xf32> to vector<8x32xf32>
    %208 = vector.extract_strided_slice %199 {offsets = [0, 96], sizes = [8, 32], strides = [1, 1]} : vector<8x128xf32> to vector<8x32xf32>
    %209 = arith.mulf %206, %157 : vector<8x32xf32>
    %210 = arith.mulf %205, %208 : vector<8x32xf32>
    %211 = arith.addf %209, %210 : vector<8x32xf32>
    %212 = math.tanh %211 : vector<8x32xf32>
    %213 = arith.mulf %207, %212 : vector<8x32xf32>
    %c24_68 = arith.constant 24 : index
    %c256_69 = arith.constant 256 : index
    %214 = vector.load %arg12[%c24_68, %c256_69] : memref<64x384xf32, #tpu.memory_space<vmem>>, vector<8x128xf32>
    %cst_70 = arith.constant dense<0.000000e+00> : vector<8x128xf32>
    %215 = tpu.matmul %177, %9, %cst_70 {dimension_numbers = #tpu.dot_dimension_numbers<[1], [0], [0], [1], [0, 0, 1, 1], [], []>} : vector<8x32xf32>, vector<32x128xf32>, vector<8x128xf32> -> vector<8x128xf32>
    %216 = arith.addf %214, %215 : vector<8x128xf32>
    %217 = math.tanh %216 : vector<8x128xf32>
    %218 = vector.extract_strided_slice %217 {offsets = [0, 0], sizes = [8, 96], strides = [1, 1]} : vector<8x128xf32> to vector<8x96xf32>
    %cst_71 = arith.constant 5.000000e-01 : f32
    %219 = vector.broadcast %cst_71 : f32 to vector<8x96xf32>
    %220 = arith.mulf %218, %219 : vector<8x96xf32>
    %cst_72 = arith.constant 5.000000e-01 : f32
    %221 = vector.broadcast %cst_72 : f32 to vector<8x96xf32>
    %222 = arith.addf %220, %221 : vector<8x96xf32>
    %223 = vector.extract_strided_slice %222 {offsets = [0, 0], sizes = [8, 32], strides = [1, 1]} : vector<8x96xf32> to vector<8x32xf32>
    %224 = vector.extract_strided_slice %222 {offsets = [0, 32], sizes = [8, 32], strides = [1, 1]} : vector<8x96xf32> to vector<8x32xf32>
    %225 = vector.extract_strided_slice %222 {offsets = [0, 64], sizes = [8, 32], strides = [1, 1]} : vector<8x96xf32> to vector<8x32xf32>
    %226 = vector.extract_strided_slice %217 {offsets = [0, 96], sizes = [8, 32], strides = [1, 1]} : vector<8x128xf32> to vector<8x32xf32>
    %227 = arith.mulf %224, %175 : vector<8x32xf32>
    %228 = arith.mulf %223, %226 : vector<8x32xf32>
    %229 = arith.addf %227, %228 : vector<8x32xf32>
    %230 = math.tanh %229 : vector<8x32xf32>
    %231 = arith.mulf %225, %230 : vector<8x32xf32>
    %c32 = arith.constant 32 : index
    %c0_73 = arith.constant 0 : index
    %232 = vector.load %arg12[%c32, %c0_73] : memref<64x384xf32, #tpu.memory_space<vmem>>, vector<8x128xf32>
    %cst_74 = arith.constant dense<0.000000e+00> : vector<8x128xf32>
    %233 = tpu.matmul %195, %5, %cst_74 {dimension_numbers = #tpu.dot_dimension_numbers<[1], [0], [0], [1], [0, 0, 1, 1], [], []>} : vector<8x32xf32>, vector<32x128xf32>, vector<8x128xf32> -> vector<8x128xf32>
    %234 = arith.addf %232, %233 : vector<8x128xf32>
    %235 = math.tanh %234 : vector<8x128xf32>
    %236 = vector.extract_strided_slice %235 {offsets = [0, 0], sizes = [8, 96], strides = [1, 1]} : vector<8x128xf32> to vector<8x96xf32>
    %cst_75 = arith.constant 5.000000e-01 : f32
    %237 = vector.broadcast %cst_75 : f32 to vector<8x96xf32>
    %238 = arith.mulf %236, %237 : vector<8x96xf32>
    %cst_76 = arith.constant 5.000000e-01 : f32
    %239 = vector.broadcast %cst_76 : f32 to vector<8x96xf32>
    %240 = arith.addf %238, %239 : vector<8x96xf32>
    %241 = vector.extract_strided_slice %240 {offsets = [0, 0], sizes = [8, 32], strides = [1, 1]} : vector<8x96xf32> to vector<8x32xf32>
    %242 = vector.extract_strided_slice %240 {offsets = [0, 32], sizes = [8, 32], strides = [1, 1]} : vector<8x96xf32> to vector<8x32xf32>
    %243 = vector.extract_strided_slice %240 {offsets = [0, 64], sizes = [8, 32], strides = [1, 1]} : vector<8x96xf32> to vector<8x32xf32>
    %244 = vector.extract_strided_slice %235 {offsets = [0, 96], sizes = [8, 32], strides = [1, 1]} : vector<8x128xf32> to vector<8x32xf32>
    %245 = arith.mulf %242, %193 : vector<8x32xf32>
    %246 = arith.mulf %241, %244 : vector<8x32xf32>
    %247 = arith.addf %245, %246 : vector<8x32xf32>
    %248 = math.tanh %247 : vector<8x32xf32>
    %249 = arith.mulf %243, %248 : vector<8x32xf32>
    %c32_77 = arith.constant 32 : index
    %c128_78 = arith.constant 128 : index
    %250 = vector.load %arg12[%c32_77, %c128_78] : memref<64x384xf32, #tpu.memory_space<vmem>>, vector<8x128xf32>
    %cst_79 = arith.constant dense<0.000000e+00> : vector<8x128xf32>
    %251 = tpu.matmul %213, %7, %cst_79 {dimension_numbers = #tpu.dot_dimension_numbers<[1], [0], [0], [1], [0, 0, 1, 1], [], []>} : vector<8x32xf32>, vector<32x128xf32>, vector<8x128xf32> -> vector<8x128xf32>
    %252 = arith.addf %250, %251 : vector<8x128xf32>
    %253 = math.tanh %252 : vector<8x128xf32>
    %254 = vector.extract_strided_slice %253 {offsets = [0, 0], sizes = [8, 96], strides = [1, 1]} : vector<8x128xf32> to vector<8x96xf32>
    %cst_80 = arith.constant 5.000000e-01 : f32
    %255 = vector.broadcast %cst_80 : f32 to vector<8x96xf32>
    %256 = arith.mulf %254, %255 : vector<8x96xf32>
    %cst_81 = arith.constant 5.000000e-01 : f32
    %257 = vector.broadcast %cst_81 : f32 to vector<8x96xf32>
    %258 = arith.addf %256, %257 : vector<8x96xf32>
    %259 = vector.extract_strided_slice %258 {offsets = [0, 0], sizes = [8, 32], strides = [1, 1]} : vector<8x96xf32> to vector<8x32xf32>
    %260 = vector.extract_strided_slice %258 {offsets = [0, 32], sizes = [8, 32], strides = [1, 1]} : vector<8x96xf32> to vector<8x32xf32>
    %261 = vector.extract_strided_slice %258 {offsets = [0, 64], sizes = [8, 32], strides = [1, 1]} : vector<8x96xf32> to vector<8x32xf32>
    %262 = vector.extract_strided_slice %253 {offsets = [0, 96], sizes = [8, 32], strides = [1, 1]} : vector<8x128xf32> to vector<8x32xf32>
    %263 = arith.mulf %260, %211 : vector<8x32xf32>
    %264 = arith.mulf %259, %262 : vector<8x32xf32>
    %265 = arith.addf %263, %264 : vector<8x32xf32>
    %266 = math.tanh %265 : vector<8x32xf32>
    %267 = arith.mulf %261, %266 : vector<8x32xf32>
    %c32_82 = arith.constant 32 : index
    %c256_83 = arith.constant 256 : index
    %268 = vector.load %arg12[%c32_82, %c256_83] : memref<64x384xf32, #tpu.memory_space<vmem>>, vector<8x128xf32>
    %cst_84 = arith.constant dense<0.000000e+00> : vector<8x128xf32>
    %269 = tpu.matmul %231, %9, %cst_84 {dimension_numbers = #tpu.dot_dimension_numbers<[1], [0], [0], [1], [0, 0, 1, 1], [], []>} : vector<8x32xf32>, vector<32x128xf32>, vector<8x128xf32> -> vector<8x128xf32>
    %270 = arith.addf %268, %269 : vector<8x128xf32>
    %271 = math.tanh %270 : vector<8x128xf32>
    %272 = vector.extract_strided_slice %271 {offsets = [0, 0], sizes = [8, 96], strides = [1, 1]} : vector<8x128xf32> to vector<8x96xf32>
    %cst_85 = arith.constant 5.000000e-01 : f32
    %273 = vector.broadcast %cst_85 : f32 to vector<8x96xf32>
    %274 = arith.mulf %272, %273 : vector<8x96xf32>
    %cst_86 = arith.constant 5.000000e-01 : f32
    %275 = vector.broadcast %cst_86 : f32 to vector<8x96xf32>
    %276 = arith.addf %274, %275 : vector<8x96xf32>
    %277 = vector.extract_strided_slice %276 {offsets = [0, 0], sizes = [8, 32], strides = [1, 1]} : vector<8x96xf32> to vector<8x32xf32>
    %278 = vector.extract_strided_slice %276 {offsets = [0, 32], sizes = [8, 32], strides = [1, 1]} : vector<8x96xf32> to vector<8x32xf32>
    %279 = vector.extract_strided_slice %276 {offsets = [0, 64], sizes = [8, 32], strides = [1, 1]} : vector<8x96xf32> to vector<8x32xf32>
    %280 = vector.extract_strided_slice %271 {offsets = [0, 96], sizes = [8, 32], strides = [1, 1]} : vector<8x128xf32> to vector<8x32xf32>
    %281 = arith.mulf %278, %229 : vector<8x32xf32>
    %282 = arith.mulf %277, %280 : vector<8x32xf32>
    %283 = arith.addf %281, %282 : vector<8x32xf32>
    %284 = math.tanh %283 : vector<8x32xf32>
    %285 = arith.mulf %279, %284 : vector<8x32xf32>
    %c40 = arith.constant 40 : index
    %c0_87 = arith.constant 0 : index
    %286 = vector.load %arg12[%c40, %c0_87] : memref<64x384xf32, #tpu.memory_space<vmem>>, vector<8x128xf32>
    %cst_88 = arith.constant dense<0.000000e+00> : vector<8x128xf32>
    %287 = tpu.matmul %249, %5, %cst_88 {dimension_numbers = #tpu.dot_dimension_numbers<[1], [0], [0], [1], [0, 0, 1, 1], [], []>} : vector<8x32xf32>, vector<32x128xf32>, vector<8x128xf32> -> vector<8x128xf32>
    %288 = arith.addf %286, %287 : vector<8x128xf32>
    %289 = math.tanh %288 : vector<8x128xf32>
    %290 = vector.extract_strided_slice %289 {offsets = [0, 0], sizes = [8, 96], strides = [1, 1]} : vector<8x128xf32> to vector<8x96xf32>
    %cst_89 = arith.constant 5.000000e-01 : f32
    %291 = vector.broadcast %cst_89 : f32 to vector<8x96xf32>
    %292 = arith.mulf %290, %291 : vector<8x96xf32>
    %cst_90 = arith.constant 5.000000e-01 : f32
    %293 = vector.broadcast %cst_90 : f32 to vector<8x96xf32>
    %294 = arith.addf %292, %293 : vector<8x96xf32>
    %295 = vector.extract_strided_slice %294 {offsets = [0, 0], sizes = [8, 32], strides = [1, 1]} : vector<8x96xf32> to vector<8x32xf32>
    %296 = vector.extract_strided_slice %294 {offsets = [0, 32], sizes = [8, 32], strides = [1, 1]} : vector<8x96xf32> to vector<8x32xf32>
    %297 = vector.extract_strided_slice %294 {offsets = [0, 64], sizes = [8, 32], strides = [1, 1]} : vector<8x96xf32> to vector<8x32xf32>
    %298 = vector.extract_strided_slice %289 {offsets = [0, 96], sizes = [8, 32], strides = [1, 1]} : vector<8x128xf32> to vector<8x32xf32>
    %299 = arith.mulf %296, %247 : vector<8x32xf32>
    %300 = arith.mulf %295, %298 : vector<8x32xf32>
    %301 = arith.addf %299, %300 : vector<8x32xf32>
    %302 = math.tanh %301 : vector<8x32xf32>
    %303 = arith.mulf %297, %302 : vector<8x32xf32>
    %c40_91 = arith.constant 40 : index
    %c128_92 = arith.constant 128 : index
    %304 = vector.load %arg12[%c40_91, %c128_92] : memref<64x384xf32, #tpu.memory_space<vmem>>, vector<8x128xf32>
    %cst_93 = arith.constant dense<0.000000e+00> : vector<8x128xf32>
    %305 = tpu.matmul %267, %7, %cst_93 {dimension_numbers = #tpu.dot_dimension_numbers<[1], [0], [0], [1], [0, 0, 1, 1], [], []>} : vector<8x32xf32>, vector<32x128xf32>, vector<8x128xf32> -> vector<8x128xf32>
    %306 = arith.addf %304, %305 : vector<8x128xf32>
    %307 = math.tanh %306 : vector<8x128xf32>
    %308 = vector.extract_strided_slice %307 {offsets = [0, 0], sizes = [8, 96], strides = [1, 1]} : vector<8x128xf32> to vector<8x96xf32>
    %cst_94 = arith.constant 5.000000e-01 : f32
    %309 = vector.broadcast %cst_94 : f32 to vector<8x96xf32>
    %310 = arith.mulf %308, %309 : vector<8x96xf32>
    %cst_95 = arith.constant 5.000000e-01 : f32
    %311 = vector.broadcast %cst_95 : f32 to vector<8x96xf32>
    %312 = arith.addf %310, %311 : vector<8x96xf32>
    %313 = vector.extract_strided_slice %312 {offsets = [0, 0], sizes = [8, 32], strides = [1, 1]} : vector<8x96xf32> to vector<8x32xf32>
    %314 = vector.extract_strided_slice %312 {offsets = [0, 32], sizes = [8, 32], strides = [1, 1]} : vector<8x96xf32> to vector<8x32xf32>
    %315 = vector.extract_strided_slice %312 {offsets = [0, 64], sizes = [8, 32], strides = [1, 1]} : vector<8x96xf32> to vector<8x32xf32>
    %316 = vector.extract_strided_slice %307 {offsets = [0, 96], sizes = [8, 32], strides = [1, 1]} : vector<8x128xf32> to vector<8x32xf32>
    %317 = arith.mulf %314, %265 : vector<8x32xf32>
    %318 = arith.mulf %313, %316 : vector<8x32xf32>
    %319 = arith.addf %317, %318 : vector<8x32xf32>
    %320 = math.tanh %319 : vector<8x32xf32>
    %321 = arith.mulf %315, %320 : vector<8x32xf32>
    %c40_96 = arith.constant 40 : index
    %c256_97 = arith.constant 256 : index
    %322 = vector.load %arg12[%c40_96, %c256_97] : memref<64x384xf32, #tpu.memory_space<vmem>>, vector<8x128xf32>
    %cst_98 = arith.constant dense<0.000000e+00> : vector<8x128xf32>
    %323 = tpu.matmul %285, %9, %cst_98 {dimension_numbers = #tpu.dot_dimension_numbers<[1], [0], [0], [1], [0, 0, 1, 1], [], []>} : vector<8x32xf32>, vector<32x128xf32>, vector<8x128xf32> -> vector<8x128xf32>
    %324 = arith.addf %322, %323 : vector<8x128xf32>
    %325 = math.tanh %324 : vector<8x128xf32>
    %326 = vector.extract_strided_slice %325 {offsets = [0, 0], sizes = [8, 96], strides = [1, 1]} : vector<8x128xf32> to vector<8x96xf32>
    %cst_99 = arith.constant 5.000000e-01 : f32
    %327 = vector.broadcast %cst_99 : f32 to vector<8x96xf32>
    %328 = arith.mulf %326, %327 : vector<8x96xf32>
    %cst_100 = arith.constant 5.000000e-01 : f32
    %329 = vector.broadcast %cst_100 : f32 to vector<8x96xf32>
    %330 = arith.addf %328, %329 : vector<8x96xf32>
    %331 = vector.extract_strided_slice %330 {offsets = [0, 0], sizes = [8, 32], strides = [1, 1]} : vector<8x96xf32> to vector<8x32xf32>
    %332 = vector.extract_strided_slice %330 {offsets = [0, 32], sizes = [8, 32], strides = [1, 1]} : vector<8x96xf32> to vector<8x32xf32>
    %333 = vector.extract_strided_slice %330 {offsets = [0, 64], sizes = [8, 32], strides = [1, 1]} : vector<8x96xf32> to vector<8x32xf32>
    %334 = vector.extract_strided_slice %325 {offsets = [0, 96], sizes = [8, 32], strides = [1, 1]} : vector<8x128xf32> to vector<8x32xf32>
    %335 = arith.mulf %332, %283 : vector<8x32xf32>
    %336 = arith.mulf %331, %334 : vector<8x32xf32>
    %337 = arith.addf %335, %336 : vector<8x32xf32>
    %338 = math.tanh %337 : vector<8x32xf32>
    %339 = arith.mulf %333, %338 : vector<8x32xf32>
    %c48 = arith.constant 48 : index
    %c0_101 = arith.constant 0 : index
    %340 = vector.load %arg12[%c48, %c0_101] : memref<64x384xf32, #tpu.memory_space<vmem>>, vector<8x128xf32>
    %cst_102 = arith.constant dense<0.000000e+00> : vector<8x128xf32>
    %341 = tpu.matmul %303, %5, %cst_102 {dimension_numbers = #tpu.dot_dimension_numbers<[1], [0], [0], [1], [0, 0, 1, 1], [], []>} : vector<8x32xf32>, vector<32x128xf32>, vector<8x128xf32> -> vector<8x128xf32>
    %342 = arith.addf %340, %341 : vector<8x128xf32>
    %343 = math.tanh %342 : vector<8x128xf32>
    %344 = vector.extract_strided_slice %343 {offsets = [0, 0], sizes = [8, 96], strides = [1, 1]} : vector<8x128xf32> to vector<8x96xf32>
    %cst_103 = arith.constant 5.000000e-01 : f32
    %345 = vector.broadcast %cst_103 : f32 to vector<8x96xf32>
    %346 = arith.mulf %344, %345 : vector<8x96xf32>
    %cst_104 = arith.constant 5.000000e-01 : f32
    %347 = vector.broadcast %cst_104 : f32 to vector<8x96xf32>
    %348 = arith.addf %346, %347 : vector<8x96xf32>
    %349 = vector.extract_strided_slice %348 {offsets = [0, 0], sizes = [8, 32], strides = [1, 1]} : vector<8x96xf32> to vector<8x32xf32>
    %350 = vector.extract_strided_slice %348 {offsets = [0, 32], sizes = [8, 32], strides = [1, 1]} : vector<8x96xf32> to vector<8x32xf32>
    %351 = vector.extract_strided_slice %348 {offsets = [0, 64], sizes = [8, 32], strides = [1, 1]} : vector<8x96xf32> to vector<8x32xf32>
    %352 = vector.extract_strided_slice %343 {offsets = [0, 96], sizes = [8, 32], strides = [1, 1]} : vector<8x128xf32> to vector<8x32xf32>
    %353 = arith.mulf %350, %301 : vector<8x32xf32>
    %354 = arith.mulf %349, %352 : vector<8x32xf32>
    %355 = arith.addf %353, %354 : vector<8x32xf32>
    %356 = math.tanh %355 : vector<8x32xf32>
    %357 = arith.mulf %351, %356 : vector<8x32xf32>
    %c48_105 = arith.constant 48 : index
    %c128_106 = arith.constant 128 : index
    %358 = vector.load %arg12[%c48_105, %c128_106] : memref<64x384xf32, #tpu.memory_space<vmem>>, vector<8x128xf32>
    %cst_107 = arith.constant dense<0.000000e+00> : vector<8x128xf32>
    %359 = tpu.matmul %321, %7, %cst_107 {dimension_numbers = #tpu.dot_dimension_numbers<[1], [0], [0], [1], [0, 0, 1, 1], [], []>} : vector<8x32xf32>, vector<32x128xf32>, vector<8x128xf32> -> vector<8x128xf32>
    %360 = arith.addf %358, %359 : vector<8x128xf32>
    %361 = math.tanh %360 : vector<8x128xf32>
    %362 = vector.extract_strided_slice %361 {offsets = [0, 0], sizes = [8, 96], strides = [1, 1]} : vector<8x128xf32> to vector<8x96xf32>
    %cst_108 = arith.constant 5.000000e-01 : f32
    %363 = vector.broadcast %cst_108 : f32 to vector<8x96xf32>
    %364 = arith.mulf %362, %363 : vector<8x96xf32>
    %cst_109 = arith.constant 5.000000e-01 : f32
    %365 = vector.broadcast %cst_109 : f32 to vector<8x96xf32>
    %366 = arith.addf %364, %365 : vector<8x96xf32>
    %367 = vector.extract_strided_slice %366 {offsets = [0, 0], sizes = [8, 32], strides = [1, 1]} : vector<8x96xf32> to vector<8x32xf32>
    %368 = vector.extract_strided_slice %366 {offsets = [0, 32], sizes = [8, 32], strides = [1, 1]} : vector<8x96xf32> to vector<8x32xf32>
    %369 = vector.extract_strided_slice %366 {offsets = [0, 64], sizes = [8, 32], strides = [1, 1]} : vector<8x96xf32> to vector<8x32xf32>
    %370 = vector.extract_strided_slice %361 {offsets = [0, 96], sizes = [8, 32], strides = [1, 1]} : vector<8x128xf32> to vector<8x32xf32>
    %371 = arith.mulf %368, %319 : vector<8x32xf32>
    %372 = arith.mulf %367, %370 : vector<8x32xf32>
    %373 = arith.addf %371, %372 : vector<8x32xf32>
    %374 = math.tanh %373 : vector<8x32xf32>
    %375 = arith.mulf %369, %374 : vector<8x32xf32>
    %c48_110 = arith.constant 48 : index
    %c256_111 = arith.constant 256 : index
    %376 = vector.load %arg12[%c48_110, %c256_111] : memref<64x384xf32, #tpu.memory_space<vmem>>, vector<8x128xf32>
    %cst_112 = arith.constant dense<0.000000e+00> : vector<8x128xf32>
    %377 = tpu.matmul %339, %9, %cst_112 {dimension_numbers = #tpu.dot_dimension_numbers<[1], [0], [0], [1], [0, 0, 1, 1], [], []>} : vector<8x32xf32>, vector<32x128xf32>, vector<8x128xf32> -> vector<8x128xf32>
    %378 = arith.addf %376, %377 : vector<8x128xf32>
    %379 = math.tanh %378 : vector<8x128xf32>
    %380 = vector.extract_strided_slice %379 {offsets = [0, 0], sizes = [8, 96], strides = [1, 1]} : vector<8x128xf32> to vector<8x96xf32>
    %cst_113 = arith.constant 5.000000e-01 : f32
    %381 = vector.broadcast %cst_113 : f32 to vector<8x96xf32>
    %382 = arith.mulf %380, %381 : vector<8x96xf32>
    %cst_114 = arith.constant 5.000000e-01 : f32
    %383 = vector.broadcast %cst_114 : f32 to vector<8x96xf32>
    %384 = arith.addf %382, %383 : vector<8x96xf32>
    %385 = vector.extract_strided_slice %384 {offsets = [0, 0], sizes = [8, 32], strides = [1, 1]} : vector<8x96xf32> to vector<8x32xf32>
    %386 = vector.extract_strided_slice %384 {offsets = [0, 32], sizes = [8, 32], strides = [1, 1]} : vector<8x96xf32> to vector<8x32xf32>
    %387 = vector.extract_strided_slice %384 {offsets = [0, 64], sizes = [8, 32], strides = [1, 1]} : vector<8x96xf32> to vector<8x32xf32>
    %388 = vector.extract_strided_slice %379 {offsets = [0, 96], sizes = [8, 32], strides = [1, 1]} : vector<8x128xf32> to vector<8x32xf32>
    %389 = arith.mulf %386, %337 : vector<8x32xf32>
    %390 = arith.mulf %385, %388 : vector<8x32xf32>
    %391 = arith.addf %389, %390 : vector<8x32xf32>
    %392 = math.tanh %391 : vector<8x32xf32>
    %393 = arith.mulf %387, %392 : vector<8x32xf32>
    %c56 = arith.constant 56 : index
    %c0_115 = arith.constant 0 : index
    %394 = vector.load %arg12[%c56, %c0_115] : memref<64x384xf32, #tpu.memory_space<vmem>>, vector<8x128xf32>
    %cst_116 = arith.constant dense<0.000000e+00> : vector<8x128xf32>
    %395 = tpu.matmul %357, %5, %cst_116 {dimension_numbers = #tpu.dot_dimension_numbers<[1], [0], [0], [1], [0, 0, 1, 1], [], []>} : vector<8x32xf32>, vector<32x128xf32>, vector<8x128xf32> -> vector<8x128xf32>
    %396 = arith.addf %394, %395 : vector<8x128xf32>
    %397 = math.tanh %396 : vector<8x128xf32>
    %398 = vector.extract_strided_slice %397 {offsets = [0, 0], sizes = [8, 96], strides = [1, 1]} : vector<8x128xf32> to vector<8x96xf32>
    %cst_117 = arith.constant 5.000000e-01 : f32
    %399 = vector.broadcast %cst_117 : f32 to vector<8x96xf32>
    %400 = arith.mulf %398, %399 : vector<8x96xf32>
    %cst_118 = arith.constant 5.000000e-01 : f32
    %401 = vector.broadcast %cst_118 : f32 to vector<8x96xf32>
    %402 = arith.addf %400, %401 : vector<8x96xf32>
    %403 = vector.extract_strided_slice %402 {offsets = [0, 0], sizes = [8, 32], strides = [1, 1]} : vector<8x96xf32> to vector<8x32xf32>
    %404 = vector.extract_strided_slice %402 {offsets = [0, 32], sizes = [8, 32], strides = [1, 1]} : vector<8x96xf32> to vector<8x32xf32>
    %405 = vector.extract_strided_slice %402 {offsets = [0, 64], sizes = [8, 32], strides = [1, 1]} : vector<8x96xf32> to vector<8x32xf32>
    %406 = vector.extract_strided_slice %397 {offsets = [0, 96], sizes = [8, 32], strides = [1, 1]} : vector<8x128xf32> to vector<8x32xf32>
    %407 = arith.mulf %404, %355 : vector<8x32xf32>
    %408 = arith.mulf %403, %406 : vector<8x32xf32>
    %409 = arith.addf %407, %408 : vector<8x32xf32>
    %410 = math.tanh %409 : vector<8x32xf32>
    %411 = arith.mulf %405, %410 : vector<8x32xf32>
    %c56_119 = arith.constant 56 : index
    %c128_120 = arith.constant 128 : index
    %412 = vector.load %arg12[%c56_119, %c128_120] : memref<64x384xf32, #tpu.memory_space<vmem>>, vector<8x128xf32>
    %cst_121 = arith.constant dense<0.000000e+00> : vector<8x128xf32>
    %413 = tpu.matmul %375, %7, %cst_121 {dimension_numbers = #tpu.dot_dimension_numbers<[1], [0], [0], [1], [0, 0, 1, 1], [], []>} : vector<8x32xf32>, vector<32x128xf32>, vector<8x128xf32> -> vector<8x128xf32>
    %414 = arith.addf %412, %413 : vector<8x128xf32>
    %415 = math.tanh %414 : vector<8x128xf32>
    %416 = vector.extract_strided_slice %415 {offsets = [0, 0], sizes = [8, 96], strides = [1, 1]} : vector<8x128xf32> to vector<8x96xf32>
    %cst_122 = arith.constant 5.000000e-01 : f32
    %417 = vector.broadcast %cst_122 : f32 to vector<8x96xf32>
    %418 = arith.mulf %416, %417 : vector<8x96xf32>
    %cst_123 = arith.constant 5.000000e-01 : f32
    %419 = vector.broadcast %cst_123 : f32 to vector<8x96xf32>
    %420 = arith.addf %418, %419 : vector<8x96xf32>
    %421 = vector.extract_strided_slice %420 {offsets = [0, 0], sizes = [8, 32], strides = [1, 1]} : vector<8x96xf32> to vector<8x32xf32>
    %422 = vector.extract_strided_slice %420 {offsets = [0, 32], sizes = [8, 32], strides = [1, 1]} : vector<8x96xf32> to vector<8x32xf32>
    %423 = vector.extract_strided_slice %420 {offsets = [0, 64], sizes = [8, 32], strides = [1, 1]} : vector<8x96xf32> to vector<8x32xf32>
    %424 = vector.extract_strided_slice %415 {offsets = [0, 96], sizes = [8, 32], strides = [1, 1]} : vector<8x128xf32> to vector<8x32xf32>
    %425 = arith.mulf %422, %373 : vector<8x32xf32>
    %426 = arith.mulf %421, %424 : vector<8x32xf32>
    %427 = arith.addf %425, %426 : vector<8x32xf32>
    %428 = math.tanh %427 : vector<8x32xf32>
    %429 = arith.mulf %423, %428 : vector<8x32xf32>
    %c56_124 = arith.constant 56 : index
    %c256_125 = arith.constant 256 : index
    %430 = vector.load %arg12[%c56_124, %c256_125] : memref<64x384xf32, #tpu.memory_space<vmem>>, vector<8x128xf32>
    %cst_126 = arith.constant dense<0.000000e+00> : vector<8x128xf32>
    %431 = tpu.matmul %393, %9, %cst_126 {dimension_numbers = #tpu.dot_dimension_numbers<[1], [0], [0], [1], [0, 0, 1, 1], [], []>} : vector<8x32xf32>, vector<32x128xf32>, vector<8x128xf32> -> vector<8x128xf32>
    %432 = arith.addf %430, %431 : vector<8x128xf32>
    %433 = math.tanh %432 : vector<8x128xf32>
    %434 = vector.extract_strided_slice %433 {offsets = [0, 0], sizes = [8, 96], strides = [1, 1]} : vector<8x128xf32> to vector<8x96xf32>
    %cst_127 = arith.constant 5.000000e-01 : f32
    %435 = vector.broadcast %cst_127 : f32 to vector<8x96xf32>
    %436 = arith.mulf %434, %435 : vector<8x96xf32>
    %cst_128 = arith.constant 5.000000e-01 : f32
    %437 = vector.broadcast %cst_128 : f32 to vector<8x96xf32>
    %438 = arith.addf %436, %437 : vector<8x96xf32>
    %439 = vector.extract_strided_slice %438 {offsets = [0, 0], sizes = [8, 32], strides = [1, 1]} : vector<8x96xf32> to vector<8x32xf32>
    %440 = vector.extract_strided_slice %438 {offsets = [0, 32], sizes = [8, 32], strides = [1, 1]} : vector<8x96xf32> to vector<8x32xf32>
    %441 = vector.extract_strided_slice %438 {offsets = [0, 64], sizes = [8, 32], strides = [1, 1]} : vector<8x96xf32> to vector<8x32xf32>
    %442 = vector.extract_strided_slice %433 {offsets = [0, 96], sizes = [8, 32], strides = [1, 1]} : vector<8x128xf32> to vector<8x32xf32>
    %443 = arith.mulf %440, %391 : vector<8x32xf32>
    %444 = arith.mulf %439, %442 : vector<8x32xf32>
    %445 = arith.addf %443, %444 : vector<8x32xf32>
    %446 = math.tanh %445 : vector<8x32xf32>
    %447 = arith.mulf %441, %446 : vector<8x32xf32>
    %c0_129 = arith.constant 0 : index
    %c0_130 = arith.constant 0 : index
    %c0_131 = arith.constant 0 : index
    %448 = vector.load %arg3[%c0_129, %c0_130, %c0_131] : memref<3x32x8xf32, #tpu.memory_space<vmem>>, vector<1x32x8xf32>
    %449 = vector.shape_cast %448 : vector<1x32x8xf32> to vector<32x8xf32>
    %cst_132 = arith.constant dense<0.000000e+00> : vector<8x8xf32>
    %450 = tpu.matmul %411, %449, %cst_132 {dimension_numbers = #tpu.dot_dimension_numbers<[1], [0], [0], [1], [0, 0, 1, 1], [], []>} : vector<8x32xf32>, vector<32x8xf32>, vector<8x8xf32> -> vector<8x8xf32>
    %c1_133 = arith.constant 1 : index
    %c0_134 = arith.constant 0 : index
    %c0_135 = arith.constant 0 : index
    %451 = vector.load %arg3[%c1_133, %c0_134, %c0_135] : memref<3x32x8xf32, #tpu.memory_space<vmem>>, vector<1x32x8xf32>
    %452 = vector.shape_cast %451 : vector<1x32x8xf32> to vector<32x8xf32>
    %cst_136 = arith.constant dense<0.000000e+00> : vector<8x8xf32>
    %453 = tpu.matmul %429, %452, %cst_136 {dimension_numbers = #tpu.dot_dimension_numbers<[1], [0], [0], [1], [0, 0, 1, 1], [], []>} : vector<8x32xf32>, vector<32x8xf32>, vector<8x8xf32> -> vector<8x8xf32>
    %454 = arith.addf %450, %453 : vector<8x8xf32>
    %c2_137 = arith.constant 2 : index
    %c0_138 = arith.constant 0 : index
    %c0_139 = arith.constant 0 : index
    %455 = vector.load %arg3[%c2_137, %c0_138, %c0_139] : memref<3x32x8xf32, #tpu.memory_space<vmem>>, vector<1x32x8xf32>
    %456 = vector.shape_cast %455 : vector<1x32x8xf32> to vector<32x8xf32>
    %cst_140 = arith.constant dense<0.000000e+00> : vector<8x8xf32>
    %457 = tpu.matmul %447, %456, %cst_140 {dimension_numbers = #tpu.dot_dimension_numbers<[1], [0], [0], [1], [0, 0, 1, 1], [], []>} : vector<8x32xf32>, vector<32x8xf32>, vector<8x8xf32> -> vector<8x8xf32>
    %458 = arith.addf %454, %457 : vector<8x8xf32>
    %c0_141 = arith.constant 0 : index
    %c0_142 = arith.constant 0 : index
    %459 = vector.load %arg4[%c0_141, %c0_142] : memref<1x1xf32, #tpu.memory_space<vmem>>, vector<1x1xf32>
    %460 = vector.broadcast %459 : vector<1x1xf32> to vector<8x8xf32>
    %461 = arith.addf %458, %460 : vector<8x8xf32>
    %462 = vector.extract_strided_slice %461 {offsets = [0, 0], sizes = [8, 1], strides = [1, 1]} : vector<8x8xf32> to vector<8x1xf32>
    %463 = vector.extract_strided_slice %461 {offsets = [0, 1], sizes = [8, 1], strides = [1, 1]} : vector<8x8xf32> to vector<8x1xf32>
    %464 = vector.extract_strided_slice %461 {offsets = [0, 2], sizes = [8, 1], strides = [1, 1]} : vector<8x8xf32> to vector<8x1xf32>
    %465 = arith.maximumf %462, %463 : vector<8x1xf32>
    %466 = arith.maximumf %465, %464 : vector<8x1xf32>
    %467 = vector.broadcast %466 : vector<8x1xf32> to vector<8x8xf32>
    %468 = arith.subf %461, %467 : vector<8x8xf32>
    %469 = math.exp %468 : vector<8x8xf32>
    %470 = vector.extract_strided_slice %469 {offsets = [0, 0], sizes = [8, 1], strides = [1, 1]} : vector<8x8xf32> to vector<8x1xf32>
    %471 = vector.extract_strided_slice %469 {offsets = [0, 1], sizes = [8, 1], strides = [1, 1]} : vector<8x8xf32> to vector<8x1xf32>
    %472 = vector.extract_strided_slice %469 {offsets = [0, 2], sizes = [8, 1], strides = [1, 1]} : vector<8x8xf32> to vector<8x1xf32>
    %473 = arith.addf %470, %471 : vector<8x1xf32>
    %474 = arith.addf %473, %472 : vector<8x1xf32>
    %475 = tpu.reciprocal %474 : vector<8x1xf32> -> vector<8x1xf32>
    %476 = vector.broadcast %470 : vector<8x1xf32> to vector<8x32xf32>
    %477 = arith.mulf %476, %411 : vector<8x32xf32>
    %478 = vector.broadcast %471 : vector<8x1xf32> to vector<8x32xf32>
    %479 = arith.mulf %478, %429 : vector<8x32xf32>
    %480 = arith.addf %477, %479 : vector<8x32xf32>
    %481 = vector.broadcast %472 : vector<8x1xf32> to vector<8x32xf32>
    %482 = arith.mulf %481, %447 : vector<8x32xf32>
    %483 = arith.addf %480, %482 : vector<8x32xf32>
    %484 = vector.broadcast %475 : vector<8x1xf32> to vector<8x32xf32>
    %485 = arith.mulf %483, %484 : vector<8x32xf32>
    %c0_143 = arith.constant 0 : index
    %c0_144 = arith.constant 0 : index
    %486 = vector.load %arg5[%c0_143, %c0_144] : memref<32x32xf32, #tpu.memory_space<vmem>>, vector<32x32xf32>
    %cst_145 = arith.constant dense<0.000000e+00> : vector<8x32xf32>
    %487 = tpu.matmul %485, %486, %cst_145 {dimension_numbers = #tpu.dot_dimension_numbers<[1], [0], [0], [1], [0, 0, 1, 1], [], []>} : vector<8x32xf32>, vector<32x32xf32>, vector<8x32xf32> -> vector<8x32xf32>
    %c0_146 = arith.constant 0 : index
    %c0_147 = arith.constant 0 : index
    %488 = vector.load %arg6[%c0_146, %c0_147] : memref<1x32xf32, #tpu.memory_space<vmem>>, vector<1x32xf32>
    %489 = vector.broadcast %488 : vector<1x32xf32> to vector<8x32xf32>
    %490 = arith.addf %487, %489 : vector<8x32xf32>
    %cst_148 = arith.constant 0.000000e+00 : f32
    %491 = vector.broadcast %cst_148 : f32 to vector<8x32xf32>
    %492 = arith.maximumf %490, %491 : vector<8x32xf32>
    %c0_149 = arith.constant 0 : index
    %c0_150 = arith.constant 0 : index
    %493 = vector.load %arg7[%c0_149, %c0_150] : memref<32x32xf32, #tpu.memory_space<vmem>>, vector<32x32xf32>
    %cst_151 = arith.constant dense<0.000000e+00> : vector<8x32xf32>
    %494 = tpu.matmul %492, %493, %cst_151 {dimension_numbers = #tpu.dot_dimension_numbers<[1], [0], [0], [1], [0, 0, 1, 1], [], []>} : vector<8x32xf32>, vector<32x32xf32>, vector<8x32xf32> -> vector<8x32xf32>
    %c0_152 = arith.constant 0 : index
    %c0_153 = arith.constant 0 : index
    %495 = vector.load %arg8[%c0_152, %c0_153] : memref<1x32xf32, #tpu.memory_space<vmem>>, vector<1x32xf32>
    %496 = vector.broadcast %495 : vector<1x32xf32> to vector<8x32xf32>
    %497 = arith.addf %494, %496 : vector<8x32xf32>
    %cst_154 = arith.constant 0.000000e+00 : f32
    %498 = vector.broadcast %cst_154 : f32 to vector<8x32xf32>
    %499 = arith.maximumf %497, %498 : vector<8x32xf32>
    %c0_155 = arith.constant 0 : index
    %c0_156 = arith.constant 0 : index
    %500 = vector.load %arg9[%c0_155, %c0_156] : memref<32x128xf32, #tpu.memory_space<vmem>>, vector<32x128xf32>
    %cst_157 = arith.constant dense<0.000000e+00> : vector<8x128xf32>
    %501 = tpu.matmul %499, %500, %cst_157 {dimension_numbers = #tpu.dot_dimension_numbers<[1], [0], [0], [1], [0, 0, 1, 1], [], []>} : vector<8x32xf32>, vector<32x128xf32>, vector<8x128xf32> -> vector<8x128xf32>
    %c0_158 = arith.constant 0 : index
    %c0_159 = arith.constant 0 : index
    %502 = vector.load %arg10[%c0_158, %c0_159] : memref<8x128xf32, #tpu.memory_space<vmem>>, vector<8x128xf32>
    %503 = arith.addf %501, %502 : vector<8x128xf32>
    %c0_160 = arith.constant 0 : index
    %c0_161 = arith.constant 0 : index
    %504 = vector.load %arg11[%c0_160, %c0_161] : memref<8x128xf32, #tpu.memory_space<vmem>>, vector<8x128xf32>
    tpu.vector_store %arg11[%c0_160, %c0_161], %503 {strides = array<i32>} : memref<8x128xf32, #tpu.memory_space<vmem>>, vector<8x128xf32>,
    return
  }
}

</mosaic_0001>

<bundles_post_ra>
// kernel: tpu_custom_call.1
= control target key start
LH: loop header
LB: loop body
LE: loop exit
PB: predicated region body
PF: predicated region fallthrough
CT: control target
= control target key end

     0   :  { %s2635_s0 = inlined_call_operand.vmem [shape: f32[64,9], index: 0, kind: input, shape index: {}]   ;;  %s2636_s1 = inlined_call_operand.vmem [shape: f32[9,384], index: 1, kind: input, shape index: {}]   ;;  %s2637_s2 = inlined_call_operand.vmem [shape: f32[3,32,128], index: 2, kind: input, shape index: {}]   ;;  %s2638_s3 = inlined_call_operand.vmem [shape: f32[3,32,8], index: 3, kind: input, shape index: {}]   ;;  %s2639_s4 = inlined_call_operand.<no memory space> [shape: f32[1,1], index: 4, kind: input, shape index: {}]   ;;  %s2640_s5 = inlined_call_operand.vmem [shape: f32[32,32], index: 5, kind: input, shape index: {}]   ;;  %s2641_s6 = inlined_call_operand.hbm [shape: f32[1,32], index: 6, kind: input, shape index: {}]   ;;  %s2642_s7 = inlined_call_operand.hbm [shape: f32[32,32], index: 7, kind: input, shape index: {}]   ;;  %s2643_s8 = inlined_call_operand.hbm [shape: f32[1,32], index: 8, kind: input, shape index: {}]   ;;  %s2644_s9 = inlined_call_operand.hbm [shape: f32[32,128], index: 9, kind: input, shape index: {}]   ;;  %s2645_s10 = inlined_call_operand.vmem [shape: f32[8,128], index: 10, kind: input, shape index: {}]   ;;  %s2646_s11 = inlined_call_operand.hbm [shape: f32[8,128], index: 11, kind: output, shape index: {}]  }
   0x1   :  { %v16_v0 = vstv %s2639_s4 }
   0x2   :  { %17 = vst [vmem:[#allocation3] sm:$0x1] %v16_v0 }
   0x3   :  { %18 = vsyncpa [#allocation5], 0 }
   0x4   :  { %19 = vsyncpa [#allocation8], 0 }
   0x5   :  { %20 = vsyncpa [#allocation11], 0  ;;  %s49_s21 = sshll.u32 %s2642_s7, 4  ;;  %s50_s21 = int_to_ptr.hbm [resolvable:$true] %s49_s21 }
   0x6   :  { %21 = vsyncpa [#allocation6], 0  ;;  %s2023_s22 = smov [#allocation7]   ;;  %s39_s26 = sshll.u32 %s2641_s6, 4  ;;  %s40_s26 = int_to_ptr.hbm [resolvable:$true] %s39_s26 }
   0x7   :  { %s51_s23 = sshll.u32 %s2023_s22, 4  ;;  %s2024_s27 = smov 128   ;;  %s52_s23 = int_to_ptr.vmem [resolvable:$true] %s51_s23 }
   0x8   :  { %s2025_s28 = smov 8   ;;  %s2026_s4 = smov [#allocation4]  }
   0x9   :  { %57 = dma.hbm_to_vmem [thread:$0]  %s50_s21, 512, %s52_s23, [#allocation8], %s2024_s27, %s2024_s27, %s2025_s28  }
   0xa   :  { %s41_s29 = sshll.u32 %s2026_s4, 4  ;;  %s63_s13 = sshll.u32 %s2643_s8, 4  ;;  %s42_s29 = int_to_ptr.vmem [resolvable:$true] %s41_s29  ;;  %s64_s13 = int_to_ptr.hbm [resolvable:$true] %s63_s13 }
   0xb   :  { %44 = dma.hbm_to_vmem [thread:$0]  %s40_s26, 16, %s42_s29, [#allocation5]  }
   0xc   :  { %s73_s15 = sshll.u32 %s2644_s9, 4  ;;  %s2027_s16 = smov [#allocation9]   ;;  %s74_s15 = int_to_ptr.hbm [resolvable:$true] %s73_s15 }
   0xd   :  { %s65_s17 = sshll.u32 %s2027_s16, 4  ;;  %s2028_s6 = smov [#allocation10]   ;;  %s66_s17 = int_to_ptr.vmem [resolvable:$true] %s65_s17 }
   0xe   :  { %68 = dma.hbm_to_vmem [thread:$0]  %s64_s13, 16, %s66_s17, [#allocation8]  }
   0xf   :  { %s75_s18 = sshll.u32 %s2028_s6, 4  ;;  %s76_s18 = int_to_ptr.vmem [resolvable:$true] %s75_s18 }
  0x10   :  { %81 = dma.hbm_to_vmem [thread:$0]  %s74_s15, 512, %s76_s18, [#allocation11], %s2024_s27, %s2024_s27, %s2025_s28  }
  0x11   :  { %2015 = dma.done.wait [#allocation5], 16  }
  0x12   :  { %2016 = vsyncadd [#allocation5], 4294967280 }
  0x13   :  { %2017 = dma.done.wait [#allocation8], 528  }
  0x14   :  { %2018 = vsyncadd [#allocation8], 4294966768 }
  0x15   :  { %2019 = dma.done.wait [#allocation11], 512  }
  0x16   :  { %2020 = vsyncadd [#allocation11], 4294966784  ;;  %vm139_vm0 = vcmask 1040384   ;;  %v2116_v1 = vld [vmem:[%s2637_s2 + $0x18] sm:$0xff]  ;;  %v2121_v2 = vld [vmem:[%s2637_s2 + $0x10] sm:$0xff]  ;;  %vm114_vm1 = vcmask 72704  }
  0x17   :  { %327 = vmatpush.msra.mxu3 %v2116_v1  ;;  %v111_v3 = vld [vmem:[%s2636_s1 + $0x18] sm:$0x1]  ;;  %v2130_v4 = vld [vmem:[%s2637_s2 + $0x8] sm:$0xff]  ;;  %v108_v5 = vld [vmem:[%s2636_s1] sm:$0xff]  ;;  %v2029_v14 = vmov 0.0   ;;  %s2031_s29 = smov 64  }
  0x18   :  { %1702 = vmatpush.msk.msra.mxu0 %vm139_vm0, %v111_v3  ;;  %v100_v6 = vld [vmem:[%s2635_s0] sm:$0xff]  ;;  %v2152_v9 = vld [vmem:[%s2637_s2 + $0x38] sm:$0xff]  ;;  %v109_v10 = vld [vmem:[%s2636_s1 + $0x8] sm:$0xff]  ;;  %vm311_vm2 = vcmask 261120   ;;  %s2034_s9 = smov 127   ;;  %s2037_s26 = smov [#allocation12]  }
  0x19   :  { %328 = vmatpush.msra.mxu3 %v2121_v2  ;;  %v2143_v7 = vld [vmem:[%s2637_s2] sm:$0xff]  ;;  %v113_v11 = vld [vmem:[%s2636_s1 + $0x28] sm:$0x1]  ;;  %v2164_v12 = vld [vmem:[%s2637_s2 + $0x58] sm:$0xff]  ;;  %s1688_s27 = sshll.u32 %s2037_s26, 4  ;;  %s1689_s27 = int_to_ptr.vmem [resolvable:$true] %s1688_s27 }
  0x1a   :  { %164 = vmatpush.msra.mxu0 %v108_v5  ;;  %v112_v8 = vld [vmem:[%s2636_s1 + $0x20] sm:$0x1]  ;;  %1720 = vmatpush.msk.msra.mxu2 %vm139_vm0, %v113_v11  ;;  %v110_v13 = vld [vmem:[%s2636_s1 + $0x10] sm:$0xff]  ;;  %v2188_v17 = vld [vmem:[%s2637_s2 + $0x28] sm:$0xff] }
  0x1b   :  { %329 = vmatpush.msra.mxu3 %v2130_v4  ;;  %1703 = vmatmul.msk.f32.vlgmr.msra.gmra.mxu0 %vm114_vm1, %v100_v6  ;;  %v2176_v15 = vld [vmem:[%s2637_s2 + $0x30] sm:$0xff]  ;;  %v2195_v18 = vld [vmem:[%s2637_s2 + $0x48] sm:$0xff]  ;;  %v2201_v19 = vld [vmem:[%s2637_s2 + $0x20] sm:$0xff] }
  0x1c   :  { %1711 = vmatpush.msk.msra.mxu1 %vm139_vm0, %v112_v8  ;;  %693 = vmatpush.msrb.mxu0 %v2164_v12  ;;  %v2182_v16 = vld [vmem:[%s2637_s2 + $0x50] sm:$0xff]  ;;  %v2209_v20 = vld [vmem:[%s2637_s2 + $0x40] sm:$0xff]  ;;  %s2030_s2 = smov 32   ;;  %v101_v63 = vld [vmem:[%s2635_s0 + $0x8] sm:$0xff] }
  0x1d   :  { %330 = vmatpush.msra.mxu3 %v2143_v7  ;;  %246 = vmatpush.msra.mxu2 %v110_v13 }
  0x1e   :  { %331 = vmatmul.f32.vlgmr.msra.gmra.mxu3 %v2029_v14  ;;  %205 = vmatpush.msra.mxu1 %v109_v10 }
  0x1f   :  { %369 = vmatpush.msrb.mxu3 %v2152_v9  ;;  %1712 = vmatmul.msk.f32.vlgmr.msra.gmra.mxu1 %vm114_vm1, %v100_v6 }
  0x20   :  { %694 = vmatpush.msrb.mxu0 %v2182_v16  ;;  %1721 = vmatmul.msk.f32.vlgmr.msra.gmra.mxu2 %vm114_vm1, %v100_v6 }
  0x21   :  { %370 = vmatpush.msrb.mxu3 %v2176_v15  ;;  %740 = vmatpush.msrb.mxu1 %v2116_v1 }
  0x22   :  { %695 = vmatpush.msrb.mxu0 %v2195_v18  ;;  %787 = vmatpush.msrb.mxu2 %v2152_v9 }
  0x23   :  { %371 = vmatpush.msrb.mxu3 %v2188_v17  ;;  %741 = vmatpush.msrb.mxu1 %v2121_v2 }
  0x24   :  { %696 = vmatpush.msrb.mxu0 %v2209_v20  ;;  %788 = vmatpush.msrb.mxu2 %v2176_v15 }
  0x25   :  { %372 = vmatpush.msrb.mxu3 %v2201_v19  ;;  %742 = vmatpush.msrb.mxu1 %v2130_v4 }
  0x26   :  { %373 = vmatmul.f32.vlgmr.msrb.gmra.mxu3 %v2029_v14  ;;  %789 = vmatpush.msrb.mxu2 %v2188_v17 }
  0x27   :  { %411 = vmatpush.msra.mxu3 %v2164_v12  ;;  %743 = vmatpush.msrb.mxu1 %v2143_v7 }
  0x28   :  { %881 = vmatpush.msra.mxu0 %v2116_v1  ;;  %790 = vmatpush.msrb.mxu2 %v2201_v19 }
  0x29   :  { %412 = vmatpush.msra.mxu3 %v2182_v16  ;;  %928 = vmatpush.msra.mxu1 %v2152_v9 }
  0x2a   :  { %882 = vmatpush.msra.mxu0 %v2121_v2  ;;  %975 = vmatpush.msra.mxu2 %v2164_v12 }
  0x2b   :  { %413 = vmatpush.msra.mxu3 %v2195_v18  ;;  %929 = vmatpush.msra.mxu1 %v2176_v15 }
  0x2c   :  { %883 = vmatpush.msra.mxu0 %v2130_v4  ;;  %976 = vmatpush.msra.mxu2 %v2182_v16 }
  0x2d   :  { %414 = vmatpush.msra.mxu3 %v2209_v20  ;;  %930 = vmatpush.msra.mxu1 %v2188_v17 }
  0x2e   :  { %415 = vmatmul.f32.vlgmr.msra.gmra.mxu3 %v2029_v14  ;;  %884 = vmatpush.msra.mxu0 %v2143_v7 }
  0x2f   :  { %458 = vmatpush.msrb.mxu3 %v2116_v1  ;;  %977 = vmatpush.msra.mxu2 %v2195_v18 }
  0x30   :  { %931 = vmatpush.msra.mxu1 %v2201_v19  ;;  %1704 = vmatmul.msk.f32.gmra.mxu0 %vm114_vm1, %v101_v63 }
  0x31   :  { %459 = vmatpush.msrb.mxu3 %v2121_v2  ;;  %978 = vmatpush.msra.mxu2 %v2209_v20 }
  0x32   :  { %1713 = vmatmul.msk.f32.gmra.mxu1 %vm114_vm1, %v101_v63  ;;  %1722 = vmatmul.msk.f32.gmra.mxu2 %vm114_vm1, %v101_v63 }
  0x33   :  { %460 = vmatpush.msrb.mxu3 %v2130_v4 }
  0x35   :  { %461 = vmatpush.msrb.mxu3 %v2143_v7 }
  0x37   :  { %505 = vmatpush.msra.mxu3 %v2152_v9 }
  0x39   :  { %506 = vmatpush.msra.mxu3 %v2176_v15 }
  0x3b   :  { %507 = vmatpush.msra.mxu3 %v2188_v17 }
  0x3d   :  { %508 = vmatpush.msra.mxu3 %v2201_v19 }
  0x98   :  { %v166_v21 = vpop.f32.mrf.mxu0 }
  0x9c   :  { %v207_v24 = vpop.f32.mrf.mxu1 }
  0xa1   :  { %v332_v22 = vpop.f32.mrf.mxu3 }
  0xa2   :  { %v335_v23 = vadd.f32 %v332_v22, %v166_v21 }
  0xa3   :  { %v248_v28 = vpop.f32.mrf.mxu2 }
  0xa4   :  { %1795 = vtanh.f32 %v335_v23 }
  0xa9   :  { %v374_v25 = vpop.f32.mrf.mxu3 }
  0xaa   :  { %v1796_v26 = vpop.eup %1795  ;;  %v377_v27 = vadd.f32 %v374_v25, %v207_v24 }
  0xab   :  { %341 = vrot.lane.b32.xlu0 %v1796_v26, %s2030_s2  ;;  %v337_v33 = vmul.f32 0.5, %v1796_v26 }
  0xac   :  { %1797 = vtanh.f32 %v377_v27 }
  0xad   :  { %v338_v34 = vadd.f32 0.5, %v337_v33  ;;  %v169_v6 = vpop.f32.mrf.mxu0 }
  0xaf   :  { %v339_v52 = vmul.f32 0.0, %v338_v34  ;;  %v210_v11 = vpop.f32.mrf.mxu1 }
  0xb1   :  { %v416_v29 = vpop.f32.mrf.mxu3 }
  0xb2   :  { %v1798_v30 = vpop.eup %1797  ;;  %v419_v31 = vadd.f32 %v416_v29, %v248_v28 }
  0xb3   :  { %383 = vrot.lane.b32.xlu0 %v1798_v30, %s2030_s2  ;;  %v379_v37 = vmul.f32 0.5, %v1798_v30 }
  0xb4   :  { %1799 = vtanh.f32 %v419_v31 }
  0xb5   :  { %v380_v38 = vadd.f32 0.5, %v379_v37  ;;  %v251_v22 = vpop.f32.mrf.mxu2 }
  0xb7   :  { %v381_v45 = vmul.f32 0.0, %v380_v38 }
  0xba   :  { %v1800_v32 = vpop.eup %1799 }
  0xbb   :  { %425 = vrot.lane.b32.xlu1 %v1800_v32, %s2030_s2  ;;  %v421_v41 = vmul.f32 0.5, %v1800_v32 }
  0xbd   :  { %v422_v42 = vadd.f32 0.5, %v421_v41 }
  0xbf   :  { %v423_v48 = vmul.f32 0.0, %v422_v42 }
 0x11d   :  { %v342_v35 = vpop.permute.xlu0 %341 }
 0x11e   :  { %v344_v36 = vmul.f32 %v342_v35, %v338_v34 }
 0x120   :  { %346 = vrot.lane.b32.xlu1 %v344_v36, %s2030_s2 }
 0x125   :  { %v384_v39 = vpop.permute.xlu0 %383 }
 0x126   :  { %v386_v40 = vmul.f32 %v384_v39, %v380_v38 }
 0x128   :  { %388 = vrot.lane.b32.xlu2 %v386_v40, %s2030_s2 }
 0x12d   :  { %v426_v43 = vpop.permute.xlu1 %425 }
 0x12e   :  { %v428_v44 = vmul.f32 %v426_v43, %v422_v42 }
 0x130   :  { %430 = vrot.lane.b32.xlu2 %v428_v44, %s2030_s2 }
 0x182   :  { %v389_v46 = vpop.permute.xlu2 %388 }
 0x183   :  { %v2250_v47 = vadd.f32 %v389_v46, %v381_v45 }
 0x185   :  { %1801 = vtanh.f32 %v2250_v47 }
 0x18a   :  { %v431_v49 = vpop.permute.xlu2 %430 }
 0x18b   :  { %v1802_v50 = vpop.eup %1801  ;;  %v2253_v51 = vadd.f32 %v431_v49, %v423_v48 }
 0x18c   :  { %394 = vrot.lane.b32.xlu1 %v1802_v50, %s2030_s2 }
 0x18d   :  { %1803 = vtanh.f32 %v2253_v51 }
 0x192   :  { %v347_v53 = vpop.permute.xlu1 %346 }
 0x193   :  { %v1804_v54 = vpop.eup %1803  ;;  %v2257_v55 = vadd.f32 %v347_v53, %v339_v52  ;;  %v102_v52 = vld [vmem:[%s2635_s0 + $0x10] sm:$0xff] }
 0x194   :  { %436 = vrot.lane.b32.xlu2 %v1804_v54, %s2030_s2  ;;  %1705 = vmatmul.msk.f32.gmra.mxu0 %vm114_vm1, %v102_v52 }
 0x195   :  { %1805 = vtanh.f32 %v2257_v55  ;;  %1723 = vmatmul.msk.f32.gmra.mxu2 %vm114_vm1, %v102_v52  ;;  %1714 = vmatmul.msk.f32.gmra.mxu1 %vm114_vm1, %v102_v52 }
 0x19b   :  { %v1806_v56 = vpop.eup %1805 }
 0x19c   :  { %352 = vrot.lane.b32.xlu0 %v1806_v56, %s2030_s2  ;;  %v105_v56 = vld [vmem:[%s2635_s0 + $0x28] sm:$0xff] }
 0x1ee   :  { %v437_v57 = vpop.permute.xlu2 %436 }
 0x1ef   :  { %v439_v58 = vmul.f32 %v437_v57, %v422_v42  ;;  %v106_v57 = vld [vmem:[%s2635_s0 + $0x30] sm:$0xff] }
 0x1f1   :  { %536 = vrot.lane.b32.xlu2 %v439_v58, %s2031_s29  ;;  %v107_v58 = vld [vmem:[%s2635_s0 + $0x38] sm:$0xff] }
 0x1fe   :  { %v395_v59 = vpop.permute.xlu1 %394 }
 0x1ff   :  { %v397_v60 = vmul.f32 %v395_v59, %v380_v38 }
 0x201   :  { %489 = vrot.lane.b32.xlu1 %v397_v60, %s2031_s29 }
 0x20e   :  { %v353_v61 = vpop.permute.xlu0 %352 }
 0x20f   :  { %v355_v62 = vmul.f32 %v353_v61, %v338_v34 }
 0x211   :  { %442 = vrot.lane.b32.xlu0 %v355_v62, %s2031_s29 }
 0x24b   :  { %v537_v5 = vpop.permute.xlu2 %536 }
 0x273   :  { %v490_v3 = vpop.permute.xlu1 %489 }
 0x283   :  { %v443_v0 = vpop.permute.xlu0 %442 }
 0x284   :  { %1737 = vmatmul.msk.f32.vlgmr.msrb.gmra.mxu3 %vm311_vm2, %v443_v0  ;;  %v172_v0 = vpop.f32.mrf.mxu0 }
 0x285   :  { %552 = vmatpush.msrb.mxu3 %v2164_v12 }
 0x287   :  { %553 = vmatpush.msrb.mxu3 %v2182_v16 }
 0x289   :  { %554 = vmatpush.msrb.mxu3 %v2195_v18 }
 0x28b   :  { %555 = vmatpush.msrb.mxu3 %v2209_v20 }
 0x28c   :  { %1738 = vmatmul.msk.f32.vlgmr.msra.gmra.mxu3 %vm311_vm2, %v490_v3 }
 0x28d   :  { %599 = vmatpush.msra.mxu3 %v2116_v1 }
 0x28f   :  { %600 = vmatpush.msra.mxu3 %v2121_v2 }
 0x291   :  { %601 = vmatpush.msra.mxu3 %v2130_v4 }
 0x293   :  { %602 = vmatpush.msra.mxu3 %v2143_v7 }
 0x294   :  { %1739 = vmatmul.msk.f32.vlgmr.msrb.gmra.mxu3 %vm311_vm2, %v537_v5 }
 0x295   :  { %646 = vmatpush.msrb.mxu3 %v2152_v9 }
 0x297   :  { %647 = vmatpush.msrb.mxu3 %v2176_v15 }
 0x299   :  { %648 = vmatpush.msrb.mxu3 %v2188_v17 }
 0x29b   :  { %649 = vmatpush.msrb.mxu3 %v2201_v19 }
 0x307   :  { %v463_v8 = vpop.f32.mrf.mxu3 }
 0x308   :  { %v466_v10 = vadd.f32 %v463_v8, %v169_v6 }
 0x30a   :  { %1807 = vtanh.f32 %v466_v10 }
 0x30f   :  { %v510_v13 = vpop.f32.mrf.mxu3 }
 0x310   :  { %v1808_v14 = vpop.eup %1807  ;;  %v513_v21 = vadd.f32 %v510_v13, %v210_v11 }
 0x311   :  { %472 = vrot.lane.b32.xlu0 %v1808_v14, %s2030_s2  ;;  %v468_v31 = vmul.f32 0.5, %v1808_v14  ;;  %v254_v14 = vpop.f32.mrf.mxu2 }
 0x312   :  { %1809 = vtanh.f32 %v513_v21 }
 0x313   :  { %v469_v32 = vadd.f32 0.5, %v468_v31 }
 0x315   :  { %v470_v43 = vmul.f32 %v469_v32, %v2257_v55  ;;  %v104_v55 = vld [vmem:[%s2635_s0 + $0x20] sm:$0xff] }
 0x317   :  { %v557_v23 = vpop.f32.mrf.mxu3 }
 0x318   :  { %v1810_v24 = vpop.eup %1809  ;;  %v560_v25 = vadd.f32 %v557_v23, %v251_v22 }
 0x319   :  { %519 = vrot.lane.b32.xlu1 %v1810_v24, %s2030_s2  ;;  %v515_v35 = vmul.f32 0.5, %v1810_v24 }
 0x31a   :  { %1811 = vtanh.f32 %v560_v25 }
 0x31b   :  { %v516_v36 = vadd.f32 0.5, %v515_v35 }
 0x31d   :  { %v517_v46 = vmul.f32 %v516_v36, %v2250_v47  ;;  %v103_v47 = vld [vmem:[%s2635_s0 + $0x18] sm:$0xff] }
 0x31e   :  { %1706 = vmatmul.msk.f32.gmra.mxu0 %vm114_vm1, %v103_v47  ;;  %1724 = vmatmul.msk.f32.gmra.mxu2 %vm114_vm1, %v103_v47 }
 0x31f   :  { %1715 = vmatmul.msk.f32.gmra.mxu1 %vm114_vm1, %v103_v47 }
 0x320   :  { %v1812_v26 = vpop.eup %1811 }
 0x321   :  { %566 = vrot.lane.b32.xlu2 %v1812_v26, %s2030_s2  ;;  %v562_v27 = vmul.f32 0.5, %v1812_v26  ;;  %v213_v26 = vpop.f32.mrf.mxu1 }
 0x323   :  { %v563_v28 = vadd.f32 0.5, %v562_v27 }
 0x325   :  { %v564_v39 = vmul.f32 %v563_v28, %v2253_v51 }
 0x326   :  { %1707 = vmatmul.msk.f32.gmra.mxu0 %vm114_vm1, %v104_v55  ;;  %1725 = vmatmul.msk.f32.gmra.mxu2 %vm114_vm1, %v104_v55 }
 0x327   :  { %1716 = vmatmul.msk.f32.gmra.mxu1 %vm114_vm1, %v104_v55 }
 0x32e   :  { %1708 = vmatmul.msk.f32.gmra.mxu0 %vm114_vm1, %v105_v56  ;;  %1726 = vmatmul.msk.f32.gmra.mxu2 %vm114_vm1, %v105_v56 }
 0x32f   :  { %1717 = vmatmul.msk.f32.gmra.mxu1 %vm114_vm1, %v105_v56 }
 0x336   :  { %1709 = vmatmul.msk.f32.gmra.mxu0 %vm114_vm1, %v106_v57  ;;  %1727 = vmatmul.msk.f32.gmra.mxu2 %vm114_vm1, %v106_v57 }
 0x337   :  { %1718 = vmatmul.msk.f32.gmra.mxu1 %vm114_vm1, %v106_v57 }
 0x33e   :  { %1710 = vmatmul.msk.f32.gmra.mxu0 %vm114_vm1, %v107_v58  ;;  %1728 = vmatmul.msk.f32.gmra.mxu2 %vm114_vm1, %v107_v58 }
 0x33f   :  { %1719 = vmatmul.msk.f32.gmra.mxu1 %vm114_vm1, %v107_v58 }
 0x37b   :  { %v567_v29 = vpop.permute.xlu2 %566 }
 0x37c   :  { %v569_v30 = vmul.f32 %v567_v29, %v563_v28 }
 0x37e   :  { %571 = vrot.lane.b32.xlu2 %v569_v30, %s2030_s2 }
 0x383   :  { %v473_v33 = vpop.permute.xlu0 %472 }
 0x384   :  { %v475_v34 = vmul.f32 %v473_v33, %v469_v32 }
 0x386   :  { %477 = vrot.lane.b32.xlu0 %v475_v34, %s2030_s2 }
 0x38b   :  { %v520_v37 = vpop.permute.xlu1 %519 }
 0x38c   :  { %v522_v38 = vmul.f32 %v520_v37, %v516_v36 }
 0x38e   :  { %524 = vrot.lane.b32.xlu1 %v522_v38, %s2030_s2 }
 0x39b   :  { %v2351_v3 = vpop.f32.mrf.mxu0 }
 0x3a3   :  { %v2356_v6 = vpop.f32.mrf.mxu0 }
 0x3ab   :  { %v2364_v10 = vpop.f32.mrf.mxu0 }
 0x3b3   :  { %v2367_v11 = vpop.f32.mrf.mxu0 }
 0x3bb   :  { %v2369_v13 = vpop.f32.mrf.mxu0 }
 0x3d8   :  { %v572_v40 = vpop.permute.xlu2 %571 }
 0x3d9   :  { %v2293_v41 = vadd.f32 %v572_v40, %v564_v39 }
 0x3db   :  { %1813 = vtanh.f32 %v2293_v41 }
 0x3e1   :  { %v1814_v42 = vpop.eup %1813 }
 0x3e2   :  { %577 = vrot.lane.b32.xlu2 %v1814_v42, %s2030_s2 }
 0x3f8   :  { %v478_v44 = vpop.permute.xlu0 %477 }
 0x3f9   :  { %v2298_v45 = vadd.f32 %v478_v44, %v470_v43 }
 0x3fb   :  { %1815 = vtanh.f32 %v2298_v45 }
 0x400   :  { %v525_v48 = vpop.permute.xlu1 %524 }
 0x401   :  { %v1816_v49 = vpop.eup %1815  ;;  %v2302_v50 = vadd.f32 %v525_v48, %v517_v46 }
 0x402   :  { %483 = vrot.lane.b32.xlu0 %v1816_v49, %s2030_s2 }
 0x403   :  { %1817 = vtanh.f32 %v2302_v50 }
 0x409   :  { %v1818_v51 = vpop.eup %1817 }
 0x40a   :  { %530 = vrot.lane.b32.xlu1 %v1818_v51, %s2030_s2 }
 0x43c   :  { %v578_v53 = vpop.permute.xlu2 %577 }
 0x43d   :  { %v580_v54 = vmul.f32 %v578_v53, %v563_v28 }
 0x43f   :  { %677 = vrot.lane.b32.xlu2 %v580_v54, %s2031_s29 }
 0x474   :  { %v484_v59 = vpop.permute.xlu0 %483 }
 0x475   :  { %v486_v60 = vmul.f32 %v484_v59, %v469_v32 }
 0x477   :  { %583 = vrot.lane.b32.xlu0 %v486_v60, %s2031_s29 }
 0x47c   :  { %v531_v61 = vpop.permute.xlu1 %530 }
 0x47d   :  { %v533_v62 = vmul.f32 %v531_v61, %v516_v36 }
 0x47f   :  { %630 = vrot.lane.b32.xlu1 %v533_v62, %s2031_s29 }
 0x499   :  { %v678_v63 = vpop.permute.xlu2 %677 }
 0x49a   :  { %1742 = vmatmul.msk.f32.vlgmr.msrb.gmra.mxu0 %vm311_vm2, %v678_v63  ;;  %v216_v63 = vpop.f32.mrf.mxu1 }
 0x49b   :  { %1069 = vmatpush.msrb.mxu0 %v2152_v9 }
 0x49d   :  { %1070 = vmatpush.msrb.mxu0 %v2176_v15 }
 0x49f   :  { %1071 = vmatpush.msrb.mxu0 %v2188_v17 }
 0x4a1   :  { %1072 = vmatpush.msrb.mxu0 %v2201_v19 }
 0x4e9   :  { %v584_v5 = vpop.permute.xlu0 %583 }
 0x4ea   :  { %1740 = vmatmul.msk.f32.vlgmr.msra.gmra.mxu3 %vm311_vm2, %v584_v5 }
 0x4eb   :  { %834 = vmatpush.msra.mxu3 %v2164_v12 }
 0x4ed   :  { %835 = vmatpush.msra.mxu3 %v2182_v16 }
 0x4ef   :  { %836 = vmatpush.msra.mxu3 %v2195_v18 }
 0x4f1   :  { %v631_v8 = vpop.permute.xlu1 %630  ;;  %837 = vmatpush.msra.mxu3 %v2209_v20 }
 0x4f2   :  { %1741 = vmatmul.msk.f32.vlgmr.msrb.gmra.mxu3 %vm311_vm2, %v631_v8 }
 0x4f3   :  { %1022 = vmatpush.msrb.mxu3 %v2116_v1 }
 0x4f5   :  { %1023 = vmatpush.msrb.mxu3 %v2121_v2 }
 0x4f7   :  { %1024 = vmatpush.msrb.mxu3 %v2130_v4 }
 0x4f9   :  { %1025 = vmatpush.msrb.mxu3 %v2143_v7 }
 0x517   :  { %v698_v21 = vpop.f32.mrf.mxu0 }
 0x518   :  { %v701_v22 = vadd.f32 %v698_v21, %v254_v14 }
 0x51a   :  { %1819 = vtanh.f32 %v701_v22 }
 0x520   :  { %v1820_v23 = vpop.eup %1819 }
 0x521   :  { %707 = vrot.lane.b32.xlu0 %v1820_v23, %s2030_s2  ;;  %v703_v31 = vmul.f32 0.5, %v1820_v23 }
 0x523   :  { %v704_v32 = vadd.f32 0.5, %v703_v31 }
 0x525   :  { %v705_v44 = vmul.f32 %v704_v32, %v2293_v41 }
 0x56d   :  { %v604_v24 = vpop.f32.mrf.mxu3 }
 0x56e   :  { %v607_v25 = vadd.f32 %v604_v24, %v172_v0  ;;  %v2405_v0 = vpop.f32.mrf.mxu1 }
 0x570   :  { %1821 = vtanh.f32 %v607_v25  ;;  %v257_v25 = vpop.f32.mrf.mxu2 }
 0x575   :  { %v651_v27 = vpop.f32.mrf.mxu3 }
 0x576   :  { %v1822_v28 = vpop.eup %1821  ;;  %v654_v29 = vadd.f32 %v651_v27, %v213_v26  ;;  %v2407_v5 = vpop.f32.mrf.mxu1 }
 0x577   :  { %613 = vrot.lane.b32.xlu2 %v1822_v28, %s2030_s2  ;;  %v609_v35 = vmul.f32 0.5, %v1822_v28 }
 0x578   :  { %1823 = vtanh.f32 %v654_v29  ;;  %v2421_v29 = vpop.f32.mrf.mxu2 }
 0x579   :  { %v610_v36 = vadd.f32 0.5, %v609_v35 }
 0x57b   :  { %v611_v51 = vmul.f32 %v610_v36, %v2298_v45 }
 0x57e   :  { %v1824_v30 = vpop.eup %1823  ;;  %v2410_v14 = vpop.f32.mrf.mxu1 }
 0x57f   :  { %660 = vrot.lane.b32.xlu1 %v1824_v30, %s2030_s2  ;;  %v656_v39 = vmul.f32 0.5, %v1824_v30 }
 0x580   :  { %v2423_v30 = vpop.f32.mrf.mxu2 }
 0x581   :  { %v657_v40 = vadd.f32 0.5, %v656_v39 }
 0x583   :  { %v658_v41 = vmul.f32 %v657_v40, %v2302_v50 }
 0x586   :  { %v2416_v21 = vpop.f32.mrf.mxu1 }
 0x588   :  { %v2425_v31 = vpop.f32.mrf.mxu2 }
 0x593   :  { %v708_v33 = vpop.permute.xlu0 %707 }
 0x594   :  { %v710_v34 = vmul.f32 %v708_v33, %v704_v32 }
 0x596   :  { %712 = vrot.lane.b32.xlu0 %v710_v34, %s2030_s2 }
 0x5d1   :  { %v614_v37 = vpop.permute.xlu2 %613 }
 0x5d2   :  { %v616_v38 = vmul.f32 %v614_v37, %v610_v36 }
 0x5d4   :  { %618 = vrot.lane.b32.xlu2 %v616_v38, %s2030_s2 }
 0x5f1   :  { %v661_v42 = vpop.permute.xlu1 %660 }
 0x5f2   :  { %v663_v43 = vmul.f32 %v661_v42, %v657_v40 }
 0x5f4   :  { %665 = vrot.lane.b32.xlu1 %v663_v43, %s2030_s2 }
 0x608   :  { %v713_v46 = vpop.permute.xlu0 %712 }
 0x609   :  { %v2378_v48 = vadd.f32 %v713_v46, %v705_v44 }
 0x60b   :  { %1825 = vtanh.f32 %v2378_v48 }
 0x611   :  { %v1826_v49 = vpop.eup %1825 }
 0x612   :  { %718 = vrot.lane.b32.xlu0 %v1826_v49, %s2030_s2 }
 0x62e   :  { %v619_v52 = vpop.permute.xlu2 %618 }
 0x62f   :  { %v2383_v47 = vadd.f32 %v619_v52, %v611_v51 }
 0x631   :  { %1827 = vtanh.f32 %v2383_v47 }
 0x637   :  { %v1828_v53 = vpop.eup %1827 }
 0x638   :  { %624 = vrot.lane.b32.xlu2 %v1828_v53, %s2030_s2 }
 0x666   :  { %v666_v54 = vpop.permute.xlu1 %665 }
 0x667   :  { %v2388_v55 = vadd.f32 %v666_v54, %v658_v41 }
 0x669   :  { %1829 = vtanh.f32 %v2388_v55 }
 0x66f   :  { %v1830_v56 = vpop.eup %1829 }
 0x670   :  { %671 = vrot.lane.b32.xlu1 %v1830_v56, %s2030_s2 }
 0x684   :  { %v719_v57 = vpop.permute.xlu0 %718 }
 0x685   :  { %v721_v45 = vmul.f32 %v719_v57, %v704_v32  ;;  %v2427_v32 = vpop.f32.mrf.mxu2 }
 0x687   :  { %818 = vrot.lane.b32.xlu0 %v721_v45, %s2031_s29 }
 0x692   :  { %v625_v58 = vpop.permute.xlu2 %624 }
 0x693   :  { %v627_v59 = vmul.f32 %v625_v58, %v610_v36 }
 0x695   :  { %724 = vrot.lane.b32.xlu2 %v627_v59, %s2031_s29 }
 0x6e2   :  { %v672_v60 = vpop.permute.xlu1 %671 }
 0x6e3   :  { %v674_v61 = vmul.f32 %v672_v60, %v657_v40 }
 0x6e5   :  { %771 = vrot.lane.b32.xlu1 %v674_v61, %s2031_s29 }
 0x6ef   :  { %v725_v50 = vpop.permute.xlu2 %724 }
 0x6f0   :  { %1743 = vmatmul.msk.f32.vlgmr.msrb.gmra.mxu1 %vm311_vm2, %v725_v50 }
 0x6f1   :  { %1116 = vmatpush.msrb.mxu1 %v2164_v12 }
 0x6f3   :  { %1117 = vmatpush.msrb.mxu1 %v2182_v16 }
 0x6f5   :  { %1118 = vmatpush.msrb.mxu1 %v2195_v18 }
 0x6f7   :  { %1119 = vmatpush.msrb.mxu1 %v2209_v20 }
 0x6f9   :  { %v819_v62 = vpop.permute.xlu0 %818 }
 0x6fa   :  { %1745 = vmatmul.msk.f32.vlgmr.msra.gmra.mxu3 %vm311_vm2, %v819_v62 }
 0x6fb   :  { %1210 = vmatpush.msra.mxu3 %v2152_v9 }
 0x6fd   :  { %1211 = vmatpush.msra.mxu3 %v2176_v15 }
 0x6ff   :  { %1212 = vmatpush.msra.mxu3 %v2188_v17 }
 0x701   :  { %1213 = vmatpush.msra.mxu3 %v2201_v19 }
 0x757   :  { %v772_v8 = vpop.permute.xlu1 %771 }
 0x758   :  { %1744 = vmatmul.msk.f32.vlgmr.msrb.gmra.mxu2 %vm311_vm2, %v772_v8 }
 0x759   :  { %1163 = vmatpush.msrb.mxu2 %v2116_v1 }
 0x75b   :  { %1164 = vmatpush.msrb.mxu2 %v2121_v2 }
 0x75d   :  { %1165 = vmatpush.msrb.mxu2 %v2130_v4 }
 0x75f   :  { %1166 = vmatpush.msrb.mxu2 %v2143_v7 }
 0x76d   :  { %v745_v22 = vpop.f32.mrf.mxu1 }
 0x76e   :  { %v748_v23 = vadd.f32 %v745_v22, %v2351_v3 }
 0x770   :  { %1831 = vtanh.f32 %v748_v23 }
 0x776   :  { %v1832_v24 = vpop.eup %1831 }
 0x777   :  { %754 = vrot.lane.b32.xlu1 %v1832_v24, %s2030_s2  ;;  %v750_v35 = vmul.f32 0.5, %v1832_v24 }
 0x779   :  { %v751_v36 = vadd.f32 0.5, %v750_v35 }
 0x77b   :  { %v752_v52 = vmul.f32 %v751_v36, %v2383_v47 }
 0x77d   :  { %v839_v26 = vpop.f32.mrf.mxu3 }
 0x77e   :  { %v842_v27 = vadd.f32 %v839_v26, %v257_v25 }
 0x780   :  { %1833 = vtanh.f32 %v842_v27 }
 0x786   :  { %v1834_v28 = vpop.eup %1833 }
 0x787   :  { %848 = vrot.lane.b32.xlu0 %v1834_v28, %s2030_s2  ;;  %v844_v39 = vmul.f32 0.5, %v1834_v28 }
 0x789   :  { %v845_v40 = vadd.f32 0.5, %v844_v39 }
 0x78b   :  { %v846_v56 = vmul.f32 %v845_v40, %v2378_v48 }
 0x7db   :  { %v792_v3 = vpop.f32.mrf.mxu2 }
 0x7dc   :  { %v795_v33 = vadd.f32 %v792_v3, %v216_v63 }
 0x7de   :  { %1835 = vtanh.f32 %v795_v33 }
 0x7e4   :  { %v1836_v34 = vpop.eup %1835 }
 0x7e5   :  { %801 = vrot.lane.b32.xlu2 %v1836_v34, %s2030_s2  ;;  %v797_v44 = vmul.f32 0.5, %v1836_v34 }
 0x7e7   :  { %v798_v46 = vadd.f32 0.5, %v797_v44 }
 0x7e9   :  { %v755_v37 = vpop.permute.xlu1 %754  ;;  %v799_v47 = vmul.f32 %v798_v46, %v2388_v55 }
 0x7ea   :  { %v757_v38 = vmul.f32 %v755_v37, %v751_v36 }
 0x7ec   :  { %759 = vrot.lane.b32.xlu1 %v757_v38, %s2030_s2 }
 0x7f9   :  { %v849_v42 = vpop.permute.xlu0 %848 }
 0x7fa   :  { %v851_v43 = vmul.f32 %v849_v42, %v845_v40 }
 0x7fc   :  { %853 = vrot.lane.b32.xlu0 %v851_v43, %s2030_s2 }
 0x83f   :  { %v802_v49 = vpop.permute.xlu2 %801 }
 0x840   :  { %v804_v51 = vmul.f32 %v802_v49, %v798_v46 }
 0x842   :  { %806 = vrot.lane.b32.xlu2 %v804_v51, %s2030_s2 }
 0x85e   :  { %v760_v53 = vpop.permute.xlu1 %759 }
 0x85f   :  { %v2434_v41 = vadd.f32 %v760_v53, %v752_v52 }
 0x861   :  { %1837 = vtanh.f32 %v2434_v41 }
 0x867   :  { %v1838_v54 = vpop.eup %1837 }
 0x868   :  { %765 = vrot.lane.b32.xlu1 %v1838_v54, %s2030_s2 }
 0x86e   :  { %v854_v57 = vpop.permute.xlu0 %853 }
 0x86f   :  { %v2439_v45 = vadd.f32 %v854_v57, %v846_v56 }
 0x871   :  { %1839 = vtanh.f32 %v2439_v45 }
 0x877   :  { %v1840_v58 = vpop.eup %1839 }
 0x878   :  { %859 = vrot.lane.b32.xlu0 %v1840_v58, %s2030_s2 }
 0x89c   :  { %v807_v59 = vpop.permute.xlu2 %806 }
 0x89d   :  { %v2444_v60 = vadd.f32 %v807_v59, %v799_v47 }
 0x89f   :  { %1841 = vtanh.f32 %v2444_v60 }
 0x8a5   :  { %v1842_v61 = vpop.eup %1841 }
 0x8a6   :  { %812 = vrot.lane.b32.xlu2 %v1842_v61, %s2030_s2 }
 0x8da   :  { %v766_v50 = vpop.permute.xlu1 %765 }
 0x8db   :  { %v768_v48 = vmul.f32 %v766_v50, %v751_v36 }
 0x8dd   :  { %865 = vrot.lane.b32.xlu1 %v768_v48, %s2031_s29 }
 0x8ea   :  { %v860_v62 = vpop.permute.xlu0 %859 }
 0x8eb   :  { %v862_v63 = vmul.f32 %v860_v62, %v845_v40 }
 0x8ed   :  { %959 = vrot.lane.b32.xlu0 %v862_v63, %s2031_s29 }
 0x900   :  { %v813_v8 = vpop.permute.xlu2 %812 }
 0x901   :  { %v815_v22 = vmul.f32 %v813_v8, %v798_v46 }
 0x903   :  { %912 = vrot.lane.b32.xlu2 %v815_v22, %s2031_s29 }
 0x94f   :  { %v866_v55 = vpop.permute.xlu1 %865 }
 0x950   :  { %1746 = vmatmul.msk.f32.vlgmr.msra.gmra.mxu0 %vm311_vm2, %v866_v55 }
 0x951   :  { %1257 = vmatpush.msra.mxu0 %v2164_v12 }
 0x953   :  { %1258 = vmatpush.msra.mxu0 %v2182_v16 }
 0x955   :  { %1259 = vmatpush.msra.mxu0 %v2195_v18 }
 0x957   :  { %1260 = vmatpush.msra.mxu0 %v2209_v20 }
 0x95d   :  { %v913_v23 = vpop.permute.xlu2 %912 }
 0x95e   :  { %1747 = vmatmul.msk.f32.vlgmr.msra.gmra.mxu1 %vm311_vm2, %v913_v23 }
 0x95f   :  { %v960_v24 = vpop.permute.xlu0 %959  ;;  %1304 = vmatpush.msra.mxu1 %v2116_v1 }
 0x960   :  { %1748 = vmatmul.msk.f32.vlgmr.msra.gmra.mxu2 %vm311_vm2, %v960_v24 }
 0x961   :  { %1305 = vmatpush.msra.mxu1 %v2121_v2  ;;  %1351 = vmatpush.msra.mxu2 %v2152_v9 }
 0x963   :  { %1306 = vmatpush.msra.mxu1 %v2130_v4  ;;  %1352 = vmatpush.msra.mxu2 %v2176_v15 }
 0x965   :  { %1307 = vmatpush.msra.mxu1 %v2143_v7  ;;  %1353 = vmatpush.msra.mxu2 %v2188_v17 }
 0x967   :  { %1354 = vmatpush.msra.mxu2 %v2201_v19 }
 0x9cd   :  { %v886_v25 = vpop.f32.mrf.mxu0 }
 0x9ce   :  { %v889_v26 = vadd.f32 %v886_v25, %v2356_v6 }
 0x9d0   :  { %1843 = vtanh.f32 %v889_v26 }
 0x9d6   :  { %v1844_v1 = vpop.eup %1843 }
 0x9d7   :  { %895 = vrot.lane.b32.xlu0 %v1844_v1, %s2030_s2  ;;  %v891_v19 = vmul.f32 0.5, %v1844_v1 }
 0x9d9   :  { %v892_v33 = vadd.f32 0.5, %v891_v19 }
 0x9db   :  { %v933_v2 = vpop.f32.mrf.mxu1  ;;  %v893_v43 = vmul.f32 %v892_v33, %v2434_v41 }
 0x9dc   :  { %v936_v9 = vadd.f32 %v933_v2, %v2405_v0 }
 0x9de   :  { %1845 = vtanh.f32 %v936_v9 }
 0x9e3   :  { %v980_v4 = vpop.f32.mrf.mxu2 }
 0x9e4   :  { %v1846_v27 = vpop.eup %1845  ;;  %v983_v15 = vadd.f32 %v980_v4, %v2421_v29 }
 0x9e5   :  { %942 = vrot.lane.b32.xlu1 %v1846_v27, %s2030_s2  ;;  %v938_v0 = vmul.f32 0.5, %v1846_v27 }
 0x9e6   :  { %1847 = vtanh.f32 %v983_v15 }
 0x9e7   :  { %v939_v29 = vadd.f32 0.5, %v938_v0 }
 0x9e9   :  { %v940_v51 = vmul.f32 %v939_v29, %v2444_v60 }
 0x9ec   :  { %v1848_v7 = vpop.eup %1847 }
 0x9ed   :  { %989 = vrot.lane.b32.xlu2 %v1848_v7, %s2030_s2  ;;  %v985_v17 = vmul.f32 0.5, %v1848_v7 }
 0x9ef   :  { %v986_v6 = vadd.f32 0.5, %v985_v17 }
 0x9f1   :  { %v987_v38 = vmul.f32 %v986_v6, %v2439_v45 }
 0xa47   :  { %v990_v28 = vpop.permute.xlu2 %989 }
 0xa48   :  { %v992_v3 = vmul.f32 %v990_v28, %v986_v6 }
 0xa49   :  { %v896_v34 = vpop.permute.xlu0 %895 }
 0xa4a   :  { %v898_v35 = vmul.f32 %v896_v34, %v892_v33  ;;  %994 = vrot.lane.b32.xlu2 %v992_v3, %s2030_s2 }
 0xa4c   :  { %900 = vrot.lane.b32.xlu0 %v898_v35, %s2030_s2 }
 0xa57   :  { %v943_v36 = vpop.permute.xlu1 %942 }
 0xa58   :  { %v945_v37 = vmul.f32 %v943_v36, %v939_v29 }
 0xa5a   :  { %947 = vrot.lane.b32.xlu1 %v945_v37, %s2030_s2 }
 0xaa4   :  { %v995_v39 = vpop.permute.xlu2 %994 }
 0xaa5   :  { %v2476_v40 = vadd.f32 %v995_v39, %v987_v38 }
 0xaa7   :  { %1849 = vtanh.f32 %v2476_v40 }
 0xaad   :  { %v1850_v42 = vpop.eup %1849 }
 0xaae   :  { %1000 = vrot.lane.b32.xlu2 %v1850_v42, %s2030_s2 }
 0xabe   :  { %v901_v44 = vpop.permute.xlu0 %900 }
 0xabf   :  { %v2481_v46 = vadd.f32 %v901_v44, %v893_v43 }
 0xac1   :  { %1851 = vtanh.f32 %v2481_v46 }
 0xac7   :  { %v1852_v49 = vpop.eup %1851 }
 0xac8   :  { %906 = vrot.lane.b32.xlu0 %v1852_v49, %s2030_s2 }
 0xacc   :  { %v948_v52 = vpop.permute.xlu1 %947 }
 0xacd   :  { %v2486_v53 = vadd.f32 %v948_v52, %v940_v51 }
 0xacf   :  { %1853 = vtanh.f32 %v2486_v53 }
 0xad5   :  { %v1854_v54 = vpop.eup %1853 }
 0xad6   :  { %953 = vrot.lane.b32.xlu1 %v1854_v54, %s2030_s2 }
 0xb08   :  { %v1001_v56 = vpop.permute.xlu2 %1000 }
 0xb09   :  { %v1003_v41 = vmul.f32 %v1001_v56, %v986_v6 }
 0xb0b   :  { %1100 = vrot.lane.b32.xlu2 %v1003_v41, %s2031_s29 }
 0xb3a   :  { %v907_v57 = vpop.permute.xlu0 %906 }
 0xb3b   :  { %v909_v45 = vmul.f32 %v907_v57, %v892_v33 }
 0xb3d   :  { %1006 = vrot.lane.b32.xlu0 %v909_v45, %s2031_s29 }
 0xb48   :  { %v954_v58 = vpop.permute.xlu1 %953 }
 0xb49   :  { %v956_v47 = vmul.f32 %v954_v58, %v939_v29 }
 0xb4b   :  { %1053 = vrot.lane.b32.xlu1 %v956_v47, %s2031_s29 }
 0xb65   :  { %v1101_v59 = vpop.permute.xlu2 %1100 }
 0xb66   :  { %1751 = vmatmul.msk.f32.vlgmr.msrb.gmra.mxu1 %vm311_vm2, %v1101_v59 }
 0xbaf   :  { %v1007_v60 = vpop.permute.xlu0 %1006 }
 0xbb0   :  { %1749 = vmatmul.msk.f32.vlgmr.msrb.gmra.mxu3 %vm311_vm2, %v1007_v60 }
 0xbb1   :  { %1398 = vmatpush.msrb.mxu3 %v2164_v12 }
 0xbb3   :  { %1399 = vmatpush.msrb.mxu3 %v2182_v16 }
 0xbb5   :  { %1400 = vmatpush.msrb.mxu3 %v2195_v18 }
 0xbb7   :  { %1401 = vmatpush.msrb.mxu3 %v2209_v20 }
 0xbbd   :  { %v1054_v61 = vpop.permute.xlu1 %1053 }
 0xbbe   :  { %1750 = vmatmul.msk.f32.vlgmr.msrb.gmra.mxu0 %vm311_vm2, %v1054_v61 }
 0xbe3   :  { %v1121_v50 = vpop.f32.mrf.mxu1 }
 0xbe4   :  { %v1124_v48 = vadd.f32 %v1121_v50, %v2423_v30 }
 0xbe6   :  { %1855 = vtanh.f32 %v1124_v48 }
 0xbec   :  { %v1856_v62 = vpop.eup %1855 }
 0xbed   :  { %1130 = vrot.lane.b32.xlu1 %v1856_v62, %s2030_s2  ;;  %v1126_v22 = vmul.f32 0.5, %v1856_v62 }
 0xbef   :  { %v1127_v30 = vadd.f32 0.5, %v1126_v22 }
 0xbf1   :  { %v1128_v4 = vmul.f32 %v1127_v30, %v2476_v40 }
 0xc33   :  { %v1027_v63 = vpop.f32.mrf.mxu3 }
 0xc34   :  { %v1030_v8 = vadd.f32 %v1027_v63, %v2364_v10 }
 0xc36   :  { %1857 = vtanh.f32 %v1030_v8 }
 0xc3b   :  { %v1074_v12 = vpop.f32.mrf.mxu0 }
 0xc3c   :  { %v1858_v16 = vpop.eup %1857  ;;  %v1077_v18 = vadd.f32 %v1074_v12, %v2407_v5 }
 0xc3d   :  { %1036 = vrot.lane.b32.xlu2 %v1858_v16, %s2030_s2  ;;  %v1032_v24 = vmul.f32 0.5, %v1858_v16 }
 0xc3e   :  { %1859 = vtanh.f32 %v1077_v18 }
 0xc3f   :  { %v1033_v25 = vadd.f32 0.5, %v1032_v24 }
 0xc41   :  { %v1034_v17 = vmul.f32 %v1033_v25, %v2481_v46 }
 0xc44   :  { %v1860_v20 = vpop.eup %1859 }
 0xc45   :  { %1083 = vrot.lane.b32.xlu0 %v1860_v20, %s2030_s2  ;;  %v1079_v1 = vmul.f32 0.5, %v1860_v20 }
 0xc47   :  { %v1080_v5 = vadd.f32 0.5, %v1079_v1 }
 0xc49   :  { %v1081_v3 = vmul.f32 %v1080_v5, %v2486_v53 }
 0xc5f   :  { %v1131_v55 = vpop.permute.xlu1 %1130 }
 0xc60   :  { %v1133_v23 = vmul.f32 %v1131_v55, %v1127_v30 }
 0xc62   :  { %1135 = vrot.lane.b32.xlu1 %v1133_v23, %s2030_s2 }
 0xc97   :  { %v1037_v10 = vpop.permute.xlu2 %1036 }
 0xc98   :  { %v1039_v26 = vmul.f32 %v1037_v10, %v1033_v25 }
 0xc9a   :  { %1041 = vrot.lane.b32.xlu2 %v1039_v26, %s2030_s2 }
 0xcb7   :  { %v1084_v2 = vpop.permute.xlu0 %1083 }
 0xcb8   :  { %v1086_v9 = vmul.f32 %v1084_v2, %v1080_v5 }
 0xcba   :  { %1088 = vrot.lane.b32.xlu0 %v1086_v9, %s2030_s2 }
 0xcd4   :  { %v1136_v27 = vpop.permute.xlu1 %1135 }
 0xcd5   :  { %v2510_v15 = vadd.f32 %v1136_v27, %v1128_v4 }
 0xcd7   :  { %1861 = vtanh.f32 %v2510_v15 }
 0xcdd   :  { %v1862_v7 = vpop.eup %1861 }
 0xcde   :  { %1141 = vrot.lane.b32.xlu1 %v1862_v7, %s2030_s2 }
 0xcf4   :  { %v1042_v19 = vpop.permute.xlu2 %1041 }
 0xcf5   :  { %v1044_v6 = vadd.f32 %v1042_v19, %v1034_v17 }
 0xcf7   :  { %1863 = vtanh.f32 %v1044_v6 }
 0xcfd   :  { %v1864_v28 = vpop.eup %1863 }
 0xcfe   :  { %1047 = vrot.lane.b32.xlu2 %v1864_v28, %s2030_s2 }
 0xd2c   :  { %v1089_v33 = vpop.permute.xlu0 %1088 }
 0xd2d   :  { %v2517_v34 = vadd.f32 %v1089_v33, %v1081_v3 }
 0xd2f   :  { %1865 = vtanh.f32 %v2517_v34 }
 0xd35   :  { %v1866_v35 = vpop.eup %1865 }
 0xd36   :  { %1094 = vrot.lane.b32.xlu0 %v1866_v35, %s2030_s2 }
 0xd50   :  { %v1142_v0 = vpop.permute.xlu1 %1141 }
 0xd51   :  { %v1144_v29 = vmul.f32 %v1142_v0, %v1127_v30 }
 0xd53   :  { %1241 = vrot.lane.b32.xlu1 %v1144_v29, %s2031_s29 }
 0xd58   :  { %v1048_v36 = vpop.permute.xlu2 %1047 }
 0xd59   :  { %v1050_v37 = vmul.f32 %v1048_v36, %v1033_v25 }
 0xd5b   :  { %1147 = vrot.lane.b32.xlu2 %v1050_v37, %s2031_s29 }
 0xda8   :  { %v1095_v38 = vpop.permute.xlu0 %1094 }
 0xda9   :  { %v1097_v39 = vmul.f32 %v1095_v38, %v1080_v5 }
 0xdab   :  { %1194 = vrot.lane.b32.xlu0 %v1097_v39, %s2031_s29 }
 0xdb5   :  { %v1148_v40 = vpop.permute.xlu2 %1147 }
 0xdb6   :  { %1752 = vmatmul.msk.f32.vlgmr.msrb.gmra.mxu2 %vm311_vm2, %v1148_v40 }
 0xdc5   :  { %v1242_v42 = vpop.permute.xlu1 %1241 }
 0xdc6   :  { %1754 = vmatmul.msk.f32.vlgmr.msra.gmra.mxu0 %vm311_vm2, %v1242_v42 }
 0xe1d   :  { %v1195_v43 = vpop.permute.xlu0 %1194 }
 0xe1e   :  { %1753 = vmatmul.msk.f32.vlgmr.msra.gmra.mxu3 %vm311_vm2, %v1195_v43 }
 0xe39   :  { %v1168_v44 = vpop.f32.mrf.mxu2 }
 0xe3a   :  { %v1171_v46 = vadd.f32 %v1168_v44, %v2367_v11 }
 0xe3c   :  { %1867 = vtanh.f32 %v1171_v46 }
 0xe42   :  { %v1868_v49 = vpop.eup %1867 }
 0xe43   :  { %v1262_v51 = vpop.f32.mrf.mxu0  ;;  %1177 = vrot.lane.b32.xlu2 %v1868_v49, %s2030_s2  ;;  %v1173_v54 = vmul.f32 0.5, %v1868_v49 }
 0xe44   :  { %v1265_v52 = vadd.f32 %v1262_v51, %v2425_v31 }
 0xe45   :  { %v1174_v56 = vadd.f32 0.5, %v1173_v54 }
 0xe46   :  { %1869 = vtanh.f32 %v1265_v52 }
 0xe47   :  { %v1175_v61 = vmul.f32 %v1174_v56, %v1044_v6 }
 0xe4c   :  { %v1870_v53 = vpop.eup %1869 }
 0xe4d   :  { %1271 = vrot.lane.b32.xlu0 %v1870_v53, %s2030_s2  ;;  %v1267_v47 = vmul.f32 0.5, %v1870_v53 }
 0xe4f   :  { %v1268_v59 = vadd.f32 0.5, %v1267_v47  ;;  %v1430_v47 = vld [vmem:[%s2638_s3 + $0x18] sm:$0xff] }
 0xe50   :  { %1478 = vmatpush.msrb.mxu1 %v1430_v47 }
 0xe51   :  { %v1269_v16 = vmul.f32 %v1268_v59, %v2510_v15 }
 0xe9d   :  { %v1178_v41 = vpop.permute.xlu2 %1177 }
 0xe9e   :  { %v1180_v57 = vmul.f32 %v1178_v41, %v1174_v56 }
 0xea0   :  { %1182 = vrot.lane.b32.xlu2 %v1180_v57, %s2030_s2 }
 0xea1   :  { %v1215_v45 = vpop.f32.mrf.mxu3 }
 0xea2   :  { %v1218_v11 = vadd.f32 %v1215_v45, %v2410_v14 }
 0xea4   :  { %1871 = vtanh.f32 %v1218_v11 }
 0xeaa   :  { %v1872_v58 = vpop.eup %1871 }
 0xeab   :  { %1224 = vrot.lane.b32.xlu1 %v1872_v58, %s2030_s2  ;;  %v1220_v63 = vmul.f32 0.5, %v1872_v58 }
 0xead   :  { %v1221_v8 = vadd.f32 0.5, %v1220_v63  ;;  %v1765_v63 = vld [vmem:[%s2638_s3 + $0x48] sm:$0xff] }
 0xeaf   :  { %v1222_v23 = vmul.f32 %v1221_v8, %v2517_v34 }
 0xebf   :  { %v1272_v31 = vpop.permute.xlu0 %1271 }
 0xec0   :  { %v1274_v60 = vmul.f32 %v1272_v31, %v1268_v59  ;;  %v1428_v31 = vld [vmem:[%s2638_s3 + $0x8] sm:$0xff] }
 0xec2   :  { %1276 = vrot.lane.b32.xlu0 %v1274_v60, %s2030_s2  ;;  %v1427_v60 = vld [vmem:[%s2638_s3] sm:$0xff] }
 0xefa   :  { %v1183_v50 = vpop.permute.xlu2 %1182 }
 0xefb   :  { %v1185_v48 = vadd.f32 %v1183_v50, %v1175_v61  ;;  %v1767_v61 = vld [vmem:[%s2638_s3 + $0x58] sm:$0xff]  ;;  %v1766_v50 = vld [vmem:[%s2638_s3 + $0x50] sm:$0xff] }
 0xefc   :  { %1508 = vmatpush.msrb.mxu2 %v1767_v61  ;;  %v1624_v61 = vld [vmem:[#allocation7 + $0x10] sm:$0xff] }
 0xefd   :  { %1873 = vtanh.f32 %v1185_v48 }
 0xefe   :  { %1509 = vmatpush.msrb.mxu2 %v1766_v50 }
 0xf00   :  { %1510 = vmatpush.msrb.mxu2 %v1765_v63  ;;  %v1657_v63 = vld [vmem:[#allocation10 + $0x18] sm:$0xff] }
 0xf03   :  { %v1874_v62 = vpop.eup %1873 }
 0xf04   :  { %1188 = vrot.lane.b32.xlu2 %v1874_v62, %s2030_s2 }
 0xf1d   :  { %v1225_v14 = vpop.permute.xlu1 %1224 }
 0xf1e   :  { %v1227_v12 = vmul.f32 %v1225_v14, %v1221_v8 }
 0xf20   :  { %1229 = vrot.lane.b32.xlu1 %v1227_v12, %s2030_s2 }
 0xf34   :  { %v1277_v18 = vpop.permute.xlu0 %1276 }
 0xf35   :  { %v1279_v20 = vadd.f32 %v1277_v18, %v1269_v16  ;;  %v1761_v18 = vld [vmem:[%s2638_s3 + $0x38] sm:$0xff] }
 0xf36   :  { %1453 = vmatpush.msrb.mxu0 %v1761_v18  ;;  %v1655_v18 = vld [vmem:[#allocation10 + $0x8] sm:$0xff] }
 0xf37   :  { %1875 = vtanh.f32 %v1279_v20 }
 0xf3d   :  { %v1876_v22 = vpop.eup %1875 }
 0xf3e   :  { %1282 = vrot.lane.b32.xlu0 %v1876_v22, %s2030_s2  ;;  %v1759_v22 = vld [vmem:[%s2638_s3 + $0x28] sm:$0xff] }
 0xf5e   :  { %v1189_v30 = vpop.permute.xlu2 %1188 }
 0xf5f   :  { %v1191_v55 = vmul.f32 %v1189_v30, %v1174_v56  ;;  %v1758_v30 = vld [vmem:[%s2638_s3 + $0x20] sm:$0xff] }
 0xf61   :  { %1288 = vrot.lane.b32.xlu2 %v1191_v55, %s2031_s29  ;;  %v1792_v55 = vld [vmem:[#allocation3] ss:$0 sm:$0xff] }
 0xf92   :  { %v1230_v24 = vpop.permute.xlu1 %1229 }
 0xf93   :  { %v1232_v25 = vadd.f32 %v1230_v24, %v1222_v23  ;;  %v2032_v23 = vmov 0  }
 0xf94   :  { %1787 = vset.pattern.permute.xlu0 %v2032_v23  ;;  %1788 = vset.pattern.permute.xlu1 %v2032_v23 }
 0xf95   :  { %1877 = vtanh.f32 %v1232_v25 }
 0xf9b   :  { %v1878_v10 = vpop.eup %1877 }
 0xf9c   :  { %1235 = vrot.lane.b32.xlu1 %v1878_v10, %s2030_s2 }
 0xfb0   :  { %v1283_v26 = vpop.permute.xlu0 %1282 }
 0xfb1   :  { %v1285_v1 = vmul.f32 %v1283_v26, %v1268_v59  ;;  %v1429_v59 = vld [vmem:[%s2638_s3 + $0x10] sm:$0xff] }
 0xfb2   :  { %1479 = vmatpush.msrb.mxu1 %v1429_v59 }
 0xfb3   :  { %1382 = vrot.lane.b32.xlu0 %v1285_v1, %s2031_s29 }
 0xfb4   :  { %1480 = vmatpush.msrb.mxu1 %v1428_v31 }
 0xfb6   :  { %1481 = vmatpush.msrb.mxu1 %v1427_v60  ;;  %v1625_v60 = vld [vmem:[#allocation7 + $0x18] sm:$0xff] }
 0xfbb   :  { %v1289_v5 = vpop.permute.xlu2 %1288 }
 0xfbc   :  { %1755 = vmatmul.msk.f32.vlgmr.msra.gmra.mxu1 %vm311_vm2, %v1289_v5 }
 0xfbd   :  { %1674 = vmatpush.msra.mxu1 %v1657_v63 }
0x100e   :  { %v1236_v2 = vpop.permute.xlu1 %1235 }
0x100f   :  { %v1238_v9 = vmul.f32 %v1236_v2, %v1221_v8  ;;  %v1764_v8 = vld [vmem:[%s2638_s3 + $0x40] sm:$0xff] }
0x1010   :  { %1511 = vmatpush.msrb.mxu2 %v1764_v8  ;;  %v1656_v8 = vld [vmem:[#allocation10 + $0x10] sm:$0xff] }
0x1011   :  { %1335 = vrot.lane.b32.xlu1 %v1238_v9, %s2031_s29  ;;  %1675 = vmatpush.msra.mxu1 %v1656_v8 }
0x1013   :  { %1676 = vmatpush.msra.mxu1 %v1655_v18 }
0x1025   :  { %v1383_v4 = vpop.permute.xlu0 %1382 }
0x1026   :  { %1757 = vmatmul.msk.f32.vlgmr.msrb.gmra.mxu3 %vm311_vm2, %v1383_v4 }
0x1039   :  { %v1309_v27 = vpop.f32.mrf.mxu1 }
0x103a   :  { %v1312_v15 = vadd.f32 %v1309_v27, %v2369_v13 }
0x103c   :  { %1879 = vtanh.f32 %v1312_v15 }
0x1042   :  { %v1880_v7 = vpop.eup %1879 }
0x1043   :  { %1318 = vrot.lane.b32.xlu1 %v1880_v7, %s2030_s2  ;;  %v1314_v28 = vmul.f32 0.5, %v1880_v7 }
0x1045   :  { %v1315_v33 = vadd.f32 0.5, %v1314_v28 }
0x1047   :  { %v1316_v39 = vmul.f32 %v1315_v33, %v1185_v48 }
0x1083   :  { %v1336_v17 = vpop.permute.xlu1 %1335 }
0x1084   :  { %1756 = vmatmul.msk.f32.vlgmr.msra.gmra.mxu2 %vm311_vm2, %v1336_v17 }
0x10a9   :  { %v1403_v19 = vpop.f32.mrf.mxu3 }
0x10aa   :  { %v1406_v6 = vadd.f32 %v1403_v19, %v2427_v32  ;;  %v2035_v19 = vmov 1  }
0x10ab   :  { %1789 = vset.pattern.permute.xlu2 %v2035_v19 }
0x10ac   :  { %1881 = vtanh.f32 %v1406_v6  ;;  %v2036_v6 = vmov 2  }
0x10b2   :  { %v1882_v3 = vpop.eup %1881 }
0x10b3   :  { %1412 = vrot.lane.b32.xlu0 %v1882_v3, %s2030_s2  ;;  %v1408_v36 = vmul.f32 0.5, %v1882_v3 }
0x10b5   :  { %v1319_v34 = vpop.permute.xlu1 %1318  ;;  %v1409_v37 = vadd.f32 0.5, %v1408_v36 }
0x10b6   :  { %v1321_v35 = vmul.f32 %v1319_v34, %v1315_v33 }
0x10b7   :  { %v1410_v51 = vmul.f32 %v1409_v37, %v1279_v20  ;;  %v1760_v20 = vld [vmem:[%s2638_s3 + $0x30] sm:$0xff]  ;;  %s2033_s3 = smov 126  }
0x10b8   :  { %1323 = vrot.lane.b32.xlu1 %v1321_v35, %s2030_s2  ;;  %1454 = vmatpush.msrb.mxu0 %v1760_v20  ;;  %v1654_v20 = vld [vmem:[#allocation10] sm:$0xff] }
0x10b9   :  { %1677 = vmatpush.msra.mxu1 %v1654_v20 }
0x10ba   :  { %1455 = vmatpush.msrb.mxu0 %v1759_v22  ;;  %v1794_v22 = vld [vmem:[#allocation9] ss:$0 sm:$0xff] }
0x10bc   :  { %1456 = vmatpush.msrb.mxu0 %v1758_v30 }
0x10be   :  { %1645 = vmatpush.msra.mxu0 %v1625_v60 }
0x10c0   :  { %1646 = vmatpush.msra.mxu0 %v1624_v61 }
0x1107   :  { %v1356_v13 = vpop.f32.mrf.mxu2 }
0x1108   :  { %v1359_v0 = vadd.f32 %v1356_v13, %v2416_v21 }
0x110a   :  { %1883 = vtanh.f32 %v1359_v0 }
0x1110   :  { %v1884_v29 = vpop.eup %1883 }
0x1111   :  { %1365 = vrot.lane.b32.xlu2 %v1884_v29, %s2030_s2  ;;  %v1361_v44 = vmul.f32 0.5, %v1884_v29 }
0x1113   :  { %v1362_v46 = vadd.f32 0.5, %v1361_v44 }
0x1115   :  { %v1363_v56 = vmul.f32 %v1362_v46, %v1232_v25 }
0x1125   :  { %v1413_v32 = vpop.permute.xlu0 %1412 }
0x1126   :  { %v1415_v38 = vmul.f32 %v1413_v32, %v1409_v37 }
0x1128   :  { %1417 = vrot.lane.b32.xlu0 %v1415_v38, %s2030_s2 }
0x112a   :  { %v1324_v40 = vpop.permute.xlu1 %1323 }
0x112b   :  { %v1326_v42 = vadd.f32 %v1324_v40, %v1316_v39 }
0x112d   :  { %1885 = vtanh.f32 %v1326_v42 }
0x1133   :  { %v1886_v43 = vpop.eup %1885 }
0x1134   :  { %1329 = vrot.lane.b32.xlu1 %v1886_v43, %s2030_s2 }
0x116b   :  { %v1366_v21 = vpop.permute.xlu2 %1365 }
0x116c   :  { %v1368_v49 = vmul.f32 %v1366_v21, %v1362_v46  ;;  %v1591_v21 = vld [vmem:[%s2640_s5 + $0x18] sm:$0xff] }
0x116d   :  { %1613 = vmatpush.msra.mxu3 %v1591_v21 }
0x116e   :  { %1370 = vrot.lane.b32.xlu2 %v1368_v49, %s2030_s2  ;;  %v1590_v49 = vld [vmem:[%s2640_s5 + $0x10] sm:$0xff] }
0x116f   :  { %1614 = vmatpush.msra.mxu3 %v1590_v49 }
0x119a   :  { %v1418_v52 = vpop.permute.xlu0 %1417 }
0x119b   :  { %v1420_v53 = vadd.f32 %v1418_v52, %v1410_v51  ;;  %v1589_v51 = vld [vmem:[%s2640_s5 + $0x8] sm:$0xff]  ;;  %v1588_v52 = vld [vmem:[%s2640_s5] sm:$0xff] }
0x119c   :  { %1615 = vmatpush.msra.mxu3 %v1589_v51 }
0x119d   :  { %1887 = vtanh.f32 %v1420_v53 }
0x119e   :  { %1616 = vmatpush.msra.mxu3 %v1588_v52 }
0x11a3   :  { %v1888_v54 = vpop.eup %1887 }
0x11a4   :  { %1423 = vrot.lane.b32.xlu0 %v1888_v54, %s2030_s2 }
0x11a6   :  { %v1330_v11 = vpop.permute.xlu1 %1329 }
0x11a7   :  { %v2559_v58 = vmul.f32 %v1330_v11, %v1315_v33 }
0x11c8   :  { %v1371_v41 = vpop.permute.xlu2 %1370 }
0x11c9   :  { %v1373_v57 = vadd.f32 %v1371_v41, %v1363_v56 }
0x11cb   :  { %1889 = vtanh.f32 %v1373_v57 }
0x11d1   :  { %v1890_v45 = vpop.eup %1889 }
0x11d2   :  { %1376 = vrot.lane.b32.xlu2 %v1890_v45, %s2030_s2  ;;  %s1690_s2 = sshll.u32 %s2646_s11, 4  ;;  %s1691_s2 = int_to_ptr.hbm [resolvable:$true] %s1690_s2 }
0x11da   :  { %1462 = vrot.lane.b32.xlu2 %v2559_v58, %s2031_s29 }
0x1216   :  { %v1424_v48 = vpop.permute.xlu0 %1423 }
0x1217   :  { %v2581_v62 = vmul.f32 %v1424_v48, %v1409_v37  ;;  %v1623_v48 = vld [vmem:[#allocation7 + $0x8] sm:$0xff] }
0x1218   :  { %1647 = vmatpush.msra.mxu0 %v1623_v48 }
0x1219   :  { %1492 = vrot.lane.b32.xlu0 %v2581_v62, %s2031_s29 }
0x1221   :  { %1521 = vperm.xlu0 %1787, %v1792_v55  }
0x1229   :  { %1790 = vset.pattern.permute.xlu0 %v2036_v6 }
0x122c   :  { %v1377_v14 = vpop.permute.xlu2 %1376 }
0x122d   :  { %v2591_v12 = vmul.f32 %v1377_v14, %v1362_v46 }
0x122f   :  { %1437 = vrot.lane.b32.xlu1 %v2591_v12, %s2031_s29 }
0x1234   :  { %v1463_v16 = vpop.permute.xlu2 %1462 }
0x1235   :  { %1763 = vmatmul.msk.f32.vlgmr.msrb.gmra.mxu1 %vm311_vm2, %v1463_v16 }
0x128b   :  { %v1493_v24 = vpop.permute.xlu0 %1492 }
0x128c   :  { %1768 = vmatmul.msk.f32.vlgmr.msrb.gmra.mxu2 %vm311_vm2, %v1493_v24  ;;  %v1658_v24 = vld [vmem:[%s2645_s10] sm:$0xff] }
0x1293   :  { %v1522_v2 = vpop.permute.xlu0 %1521 }
0x12a1   :  { %v1438_v25 = vpop.permute.xlu1 %1437 }
0x12a2   :  { %1762 = vmatmul.msk.f32.vlgmr.msrb.gmra.mxu0 %vm311_vm2, %v1438_v25 }
0x12b2   :  { %v1483_v10 = vpop.f32.mrf.mxu1 }
0x130f   :  { %v1513_v5 = vpop.f32.mrf.mxu2 }
0x131f   :  { %v1458_v26 = vpop.f32.mrf.mxu0 }
0x1320   :  { %v1484_v1 = vadd.f32 %v1483_v10, %v1458_v26 }
0x1322   :  { %v1516_v9 = vadd.f32 %v1513_v5, %v1484_v1 }
0x1324   :  { %v1524_v4 = vadd.f32 %v1522_v2, %v1516_v9 }
0x1326   :  { %1530 = vrot.lane.b32.xlu2 %v1524_v4, %s2033_s3  ;;  %1526 = vrot.lane.b32.xlu1 %v1524_v4, %s2034_s9 }
0x1380   :  { %v1531_v7 = vpop.permute.xlu2 %1530 }
0x1398   :  { %v1527_v27 = vpop.permute.xlu1 %1526 }
0x1399   :  { %v1529_v15 = vmax.f32 %v1524_v4, %v1527_v27 }
0x139b   :  { %v1533_v17 = vmax.f32 %v1529_v15, %v1531_v7 }
0x139d   :  { %1536 = vperm.xlu1 %1788, %v1533_v17  }
0x140f   :  { %v1537_v28 = vpop.permute.xlu1 %1536 }
0x1410   :  { %v1539_v3 = vsub.f32 %v1524_v4, %v1537_v28 }
0x1412   :  { %v1540_v33 = vmul.f32 1.442695, %v1539_v3 }
0x1414   :  { %1891 = vpow2.f32 %v1540_v33 }
0x141a   :  { %v1892_v34 = vpop.eup %1891 }
0x141b   :  { %1566 = vperm.xlu1 %1788, %v1892_v34   ;;  %1547 = vrot.lane.b32.xlu0 %v1892_v34, %s2033_s3 }
0x141c   :  { %1543 = vrot.lane.b32.xlu2 %v1892_v34, %s2034_s9 }
0x1423   :  { %1577 = vperm.xlu0 %1790, %v1892_v34  }
0x1424   :  { %1571 = vperm.xlu2 %1789, %v1892_v34  }
0x142b   :  { %1791 = vset.pattern.permute.xlu0 %v2032_v23 }
0x1476   :  { %v1544_v35 = vpop.permute.xlu2 %1543 }
0x1477   :  { %v1546_v13 = vadd.f32 %v1892_v34, %v1544_v35 }
0x147e   :  { %v1572_v54 = vpop.permute.xlu2 %1571 }
0x147f   :  { %v1574_v57 = vmul.f32 %v1572_v54, %v2591_v12 }
0x148d   :  { %v1548_v0 = vpop.permute.xlu0 %1547  ;;  %v1567_v53 = vpop.permute.xlu1 %1566 }
0x148e   :  { %v1550_v29 = vadd.f32 %v1548_v0, %v1546_v13  ;;  %v1569_v41 = vmul.f32 %v1567_v53, %v2559_v58  ;;  %v1622_v58 = vld [vmem:[#allocation7] sm:$0xff] }
0x148f   :  { %1648 = vmatpush.msra.mxu0 %v1622_v58 }
0x1490   :  { %1893 = vrcp.f32 %v1550_v29  ;;  %v1562_v38 = vand.u32 2147483648, %v1550_v29  ;;  %v1560_v40 = vand.u32 2147483647, %v1550_v29  ;;  %vm1556_vm4 = vweird.f32 %v1550_v29 }
0x1491   :  { %v1575_v11 = vadd.f32 %v1574_v57, %v1569_v41 }
0x1492   :  { %v1563_v43 = vor.u32 1.1754944e-38, %v1562_v38  ;;  %vm1561_vm6 = vcmp.eq.f32.partialorder %v1560_v40, 8.507059e+37 }
0x1495   :  { %v1578_v56 = vpop.permute.xlu0 %1577 }
0x1496   :  { %v1894_v36 = vpop.eup %1893  ;;  %v1580_v45 = vmul.f32 %v1578_v56, %v2581_v62  ;;  %v1793_v62 = vld [vmem:[#allocation4] ss:$0 sm:$0xff] }
0x1497   :  { %v1552_v37 = vmul.f32 %v1894_v36, %v1550_v29  ;;  %vm1557_vm3 = vweird.f32 %v1894_v36 }
0x1498   :  { %vm1558_vm5 = vmor %vm1556_vm4, %vm1557_vm3  ;;  %v1581_v47 = vadd.f32 %v1580_v45, %v1575_v11 }
0x1499   :  { %v1553_v32 = vsub.f32 1.0, %v1552_v37 }
0x149b   :  { %v1554_v39 = vmul.f32 %v1894_v36, %v1553_v32 }
0x149d   :  { %v1555_v42 = vadd.f32 %v1894_v36, %v1554_v39 }
0x149f   :  { %v1559_v44 = vsel %vm1558_vm5, %v1894_v36, %v1555_v42 }
0x14a0   :  { %v1564_v46 = vsel %vm1561_vm6, %v1563_v43, %v1559_v44 }
0x14a1   :  { %1584 = vperm.xlu1 %1788, %v1564_v46  }
0x1513   :  { %v1585_v59 = vpop.permute.xlu1 %1584 }
0x1514   :  { %v1587_v31 = vmul.f32 %v1585_v59, %v1581_v47 }
0x1516   :  { %1597 = vrot.lane.b32.xlu2 %v1587_v31, %s2031_s29 }
0x1570   :  { %v1598_v50 = vpop.permute.xlu2 %1597 }
0x1571   :  { %1769 = vmatmul.msk.f32.vlgmr.msra.gmra.mxu3 %vm311_vm2, %v1598_v50 }
0x15f4   :  { %v1618_v14 = vpop.f32.mrf.mxu3 }
0x15f5   :  { %v1619_v12 = vadd.f32 %v1793_v62, %v1618_v14 }
0x15f7   :  { %v1621_v16 = vmax.f32 %v1619_v12, 0.0 }
0x15f9   :  { %1770 = vmatmul.msk.f32.vlgmr.msra.gmra.mxu0 %vm311_vm2, %v1621_v16 }
0x1676   :  { %v1650_v30 = vpop.f32.mrf.mxu0 }
0x1677   :  { %v1651_v55 = vadd.f32 %v1794_v22, %v1650_v30 }
0x1679   :  { %v1653_v23 = vmax.f32 %v1651_v55, 0.0 }
0x167b   :  { %1771 = vmatmul.msk.f32.vlgmr.msra.gmra.mxu1 %vm311_vm2, %v1653_v23 }
0x16f8   :  { %v1679_v25 = vpop.f32.mrf.mxu1 }
0x16f9   :  { %v1680_v10 = vadd.f32 %v1679_v25, %v1658_v24 }
0x16fb   :  { %1682 = vst [vmem:[#allocation12] sm:$0xff] %v1680_v10 }
0x16fc   :  { %1693 = dma.vmem_to_hbm [thread:$0]  %s1689_s27, 128, %s1691_s2, [#allocation6]  }
0x16fd   :  { %2021 = dma.done.wait [#allocation6], 128  }
0x16fe   :  { %2022 = vsyncadd [#allocation6], 4294967168 }
0x16ff   :  { %1698 = vsyncpa [#allocation5], 1 }
0x1700   :  { %1699 = vsyncpa [#allocation8], 1 }
0x1701   :  { %1700 = vsyncpa [#allocation11], 1 }
0x1702   :  { %1701 = vsyncpa [#allocation6], 1 }

</bundles_post_ra>
